<compile_context>
chip_gen: v7x
topology: tpu7x:2x2x1
jax: 0.10.0
libtpu: 0.0.40
codegen_flags: <defaults>
</compile_context>

<pallas_src>
import functools
import math

import jax
import jax.numpy as jnp
import numpy as np
from jax import lax
from jax.experimental import pallas as pl
from jax.experimental.pallas import tpu as pltpu


# -----------------------------------------------------------------------------
# Kernel 1: K/V projection pre-pass (tiled over the sequence)
# -----------------------------------------------------------------------------
def kv_prepass_kernel(x_ref, wk_ref, bk_ref, wv_ref, bv_ref, rot_ref,
                      sin_ref, cos_ref, kr_ref, v_ref,
                      *, n_heads, key_dim, scaling):
    cd = kr_ref.dtype
    x_t = x_ref[0]                                                     # (tkv, D)
    k = jnp.dot(x_t, wk_ref[...], preferred_element_type=jnp.float32) + bk_ref[...]
    k = k * scaling                                                    # f32
    v = jnp.dot(x_t, wv_ref[...], preferred_element_type=jnp.float32) + bv_ref[...]
    sin_t = sin_ref[...]                                               # (tkv, kd) f32
    cos_t = cos_ref[...]
    for h in range(n_heads):
        kh = k[:, h * key_dim:(h + 1) * key_dim]                       # (tkv, kd) f32
        kh_rot = jnp.dot(kh, rot_ref[...], preferred_element_type=jnp.float32)
        kr_ref[0, :, pl.ds(h * key_dim, key_dim)] = \
            (kh * cos_t + kh_rot * sin_t).astype(cd)
    v_ref[0] = v.astype(cd)


# -----------------------------------------------------------------------------
# Kernel 2: streaming retention (+ group norm, swish gate, output projection)
# -----------------------------------------------------------------------------
def retention_kernel(x_ref, wq_ref, bq_ref, wg_ref, bg_ref, wo_ref, bo_ref,
                     rot_ref, sin_ref, cos_ref, kr_ref, v_ref,
                     o_ref,
                     qr_scr, acc_scr, rs_scr,
                     *, n_heads, key_dim, head_dim, tq, tkv):
    qi = pl.program_id(1)
    kv = pl.program_id(2)
    n_kv = pl.num_programs(2)
    cd = kr_ref.dtype
    q0 = qi * tq          # first query position of this tile (traced int)
    s0 = kv * tkv         # first key position of this chunk (traced int)

    # ---- once per (b, q-tile): Q projection + xpos rotation, zero accumulators
    @pl.when(kv == 0)
    def _():
        x_q = x_ref[0]                                                 # (tq, D) cd
        q = jnp.dot(x_q, wq_ref[...],
                    preferred_element_type=jnp.float32) + bq_ref[...]  # f32
        sin_q = sin_ref[...]                                           # (tq, kd) f32
        cos_q = cos_ref[...]
        for h in range(n_heads):
            qh = q[:, h * key_dim:(h + 1) * key_dim]
            qh_rot = jnp.dot(qh, rot_ref[...], preferred_element_type=jnp.float32)
            qr_scr[:, pl.ds(h * key_dim, key_dim)] = qh * cos_q + qh_rot * sin_q
        acc_scr[...] = jnp.zeros_like(acc_scr)
        rs_scr[...] = jnp.zeros_like(rs_scr)

    # ---- accumulate this kv chunk (skip chunks entirely in the future) -------
    @pl.when(s0 < q0 + tq)
    def _():
        t_pos = (q0 + lax.broadcasted_iota(jnp.int32, (tq, 1), 0)
                 ).astype(jnp.float32)                                  # abs. t
        s_rel = lax.broadcasted_iota(jnp.int32, (tkv, 1), 0).astype(jnp.float32)
        causal = (q0 + lax.broadcasted_iota(jnp.int32, (tq, tkv), 0)) >= \
                 (s0 + lax.broadcasted_iota(jnp.int32, (tq, tkv), 1))
        s0_f = s0.astype(jnp.float32)

        for h in range(n_heads):
            gamma = math.log(1.0 - 2.0 ** (-5.0 - h))                  # static < 0
            lam = math.exp(gamma)
            # analytic row normalizer: S_t = sum_{d<=t} lam^d = (1-lam^(t+1))/(1-lam)
            s_t = (1.0 - jnp.exp(gamma * (t_pos + 1.0))) / (1.0 - lam)   # (tq, 1)
            row_scale = jnp.exp((t_pos - s0_f) * gamma) * lax.rsqrt(s_t) # (tq, 1)
            col_scale = jnp.exp(-gamma * s_rel)                          # (tkv,1) >= 1

            qh = (qr_scr[:, pl.ds(h * key_dim, key_dim)] * row_scale).astype(cd)
            kh = (kr_ref[0, :, pl.ds(h * key_dim, key_dim)] * col_scale).astype(cd)
            qk = lax.dot_general(qh, kh, (((1,), (1,)), ((), ())),
                                 preferred_element_type=jnp.float32)     # (tq, tkv)
            qk = jnp.where(causal, qk, 0.0)
            rs_scr[:, pl.ds(h, 1)] += jnp.sum(qk, axis=-1, keepdims=True)
            vh = v_ref[0, :, pl.ds(h * head_dim, head_dim)]              # (tkv, hd)
            acc_scr[:, pl.ds(h * head_dim, head_dim)] += jnp.dot(
                qk.astype(cd), vh, preferred_element_type=jnp.float32)

    # ---- finalize at the last kv chunk ---------------------------------------
    @pl.when(kv == n_kv - 1)
    def _():
        for h in range(n_heads):
            oh = acc_scr[:, pl.ds(h * head_dim, head_dim)]               # (tq,hd) f32
            denom = jnp.maximum(jnp.abs(rs_scr[:, pl.ds(h, 1)]), 1.0)
            oh = oh / denom
            mu = jnp.mean(oh, axis=-1, keepdims=True)
            var = jnp.mean((oh - mu) ** 2, axis=-1, keepdims=True)
            acc_scr[:, pl.ds(h * head_dim, head_dim)] = \
                (oh - mu) * lax.rsqrt(var + 1e-5)                        # LayerNorm
        x_q = x_ref[0]
        g = jnp.dot(x_q, wg_ref[...],
                    preferred_element_type=jnp.float32) + bg_ref[...]    # (tq,2D) f32
        gate = g / (1.0 + jnp.exp(-g))                                   # swish / silu
        gated = (gate * acc_scr[...]).astype(cd)
        out = jnp.dot(gated, wo_ref[...],
                      preferred_element_type=jnp.float32) + bo_ref[...]  # (tq, D) f32
        o_ref[0] = out.astype(o_ref.dtype)


# -----------------------------------------------------------------------------
# Host-side helpers
# -----------------------------------------------------------------------------
def _rotation_matrix(d):
    """R such that rotate_every_two(x) == x @ R (block-diag 2x2 [[0,1],[-1,0]])."""
    r = np.zeros((d, d), dtype=np.float32)
    idx = np.arange(d // 2)
    r[2 * idx + 1, 2 * idx] = -1.0
    r[2 * idx, 2 * idx + 1] = 1.0
    return jnp.asarray(r)


def _sincos(seq_len, key_dim):
    angle = 1.0 / (10000.0 ** jnp.linspace(0.0, 1.0, key_dim // 2))
    angle = jnp.repeat(angle[:, None], 2, axis=1).reshape(-1)            # (key_dim,)
    index = jnp.arange(seq_len, dtype=jnp.float32)
    sin = jnp.sin(index[:, None] * angle[None, :])                       # (T, kd)
    cos = jnp.cos(index[:, None] * angle[None, :])
    return sin, cos


def _decay_mask(seq_len, n_heads):
    decay = jnp.log(1.0 - 2.0 ** (-5.0 - jnp.arange(n_heads, dtype=jnp.float32)))
    index = jnp.arange(seq_len, dtype=jnp.float32)
    diff = index[:, None] - index[None, :]
    tril = diff >= 0.0
    mask = jnp.where(tril[None], jnp.exp(diff[None] * decay[:, None, None]), 0.0)
    return mask / jnp.sqrt(jnp.sum(mask, axis=-1, keepdims=True))


def _vmem_limit_bytes():
    try:
        cap = int(pltpu.get_tpu_info().vmem_capacity_bytes)
        return int(min(cap * 3 // 4, 100 * 1024 * 1024))   # ~48 MiB v7x, ~96 MiB v5e/v6e
    except Exception:
        return 64 * 1024 * 1024


# -----------------------------------------------------------------------------
# Wrapper
# -----------------------------------------------------------------------------
def multi_scale_retention(x, params, n_heads, *, q_tile=256, kv_tile=512,
                          compute_dtype=jnp.bfloat16, single_buffer_consts=True):
    B, T, D = x.shape
    factor = 2
    assert D % n_heads == 0
    head_dim = D * factor // n_heads
    key_dim = D // n_heads
    assert key_dim % 2 == 0, "rotary pairing requires an even key_dim"
    scaling = key_dim ** (-0.5)

    tq = min(q_tile, T)
    tkv = min(kv_tile, T)
    assert T % tq == 0 and T % tkv == 0, "seq_len must divide the tile sizes"
    assert tkv <= 2048, "kv chunk must stay f32-safe for the decay factorization"
    n_qt, n_kv = T // tq, T // tkv

    cd = compute_dtype
    f32 = jnp.float32
    sin, cos = _sincos(T, key_dim)                      # (T, key_dim) f32
    rot = _rotation_matrix(key_dim)                     # (key_dim, key_dim) f32

    xw = x.astype(cd)                                   # MXU operand
    wq = params["wq"].astype(cd); wk = params["wk"].astype(cd)
    wv = params["wv"].astype(cd); wg = params["wg"].astype(cd)
    wo = params["wo"].astype(cd)
    bq = params["bq"].astype(f32); bk = params["bk"].astype(f32)
    bv = params["bv"].astype(f32); bg = params["bg"].astype(f32)
    bo = params["bo"].astype(f32)

    vmem_limit = _vmem_limit_bytes()

    def const_spec(shape):
        idx = lambda *_: (0,) * len(shape)
        if single_buffer_consts:
            # Constant blocks never change index: single-buffer them to halve VMEM.
            return pl.BlockSpec(shape, idx,
                                pipeline_mode=pl.Buffered(buffer_count=1))
        return pl.BlockSpec(shape, idx)

    # ---- pre-pass: rotated/scaled K and V projections streamed to HBM --------
    kr, v = pl.pallas_call(
        functools.partial(kv_prepass_kernel, n_heads=n_heads, key_dim=key_dim,
                          scaling=scaling),
        out_shape=(jax.ShapeDtypeStruct((B, T, D), cd),
                   jax.ShapeDtypeStruct((B, T, factor * D), cd)),
        grid=(B, n_kv),
        in_specs=[
            pl.BlockSpec((1, tkv, D), lambda b, t: (b, t, 0)),            # x tile
            const_spec((D, D)), const_spec((1, D)),                        # wk, bk
            const_spec((D, factor * D)), const_spec((1, factor * D)),      # wv, bv
            const_spec((key_dim, key_dim)),                                # rot
            pl.BlockSpec((tkv, key_dim), lambda b, t: (t, 0)),             # sin
            pl.BlockSpec((tkv, key_dim), lambda b, t: (t, 0)),             # cos
        ],
        out_specs=(pl.BlockSpec((1, tkv, D), lambda b, t: (b, t, 0)),
                   pl.BlockSpec((1, tkv, factor * D), lambda b, t: (b, t, 0))),
        compiler_params=pltpu.CompilerParams(
            dimension_semantics=("parallel", "parallel"),
            vmem_limit_bytes=vmem_limit),
    )(xw, wk, bk, wv, bv, rot, sin, cos)

    # ---- cost hint for XLA scheduling -----------------------------------------
    itemsize = np.dtype(cd).itemsize
    cost = pl.CostEstimate(
        flops=int(2 * B * T * (3 * T * D // 2 + 5 * D * D)),
        transcendentals=int(B * T * 2 * D
                            + B * n_qt * n_kv * n_heads * 2 * (tq + tkv)),
        bytes_accessed=int(B * T * D * itemsize                 # x
                           + B * T * 3 * D * itemsize           # kr + v streams
                           + B * T * D * np.dtype(x.dtype).itemsize  # output
                           + sum(int(p.size) for p in params.values()) * itemsize))

    # ---- main streaming retention kernel ---------------------------------------
    out = pl.pallas_call(
        functools.partial(retention_kernel, n_heads=n_heads, key_dim=key_dim,
                          head_dim=head_dim, tq=tq, tkv=tkv),
        out_shape=jax.ShapeDtypeStruct((B, T, D), x.dtype),
        grid=(B, n_qt, n_kv),
        in_specs=[
            pl.BlockSpec((1, tq, D), lambda b, qi, kv: (b, qi, 0)),         # x tile
            const_spec((D, D)), const_spec((1, D)),                          # wq, bq
            const_spec((D, factor * D)), const_spec((1, factor * D)),        # wg, bg
            const_spec((factor * D, D)), const_spec((1, D)),                 # wo, bo
            const_spec((key_dim, key_dim)),                                  # rot
            pl.BlockSpec((tq, key_dim), lambda b, qi, kv: (qi, 0)),          # sin
            pl.BlockSpec((tq, key_dim), lambda b, qi, kv: (qi, 0)),          # cos
            pl.BlockSpec((1, tkv, D), lambda b, qi, kv: (b, kv, 0)),         # K chunk
            pl.BlockSpec((1, tkv, factor * D), lambda b, qi, kv: (b, kv, 0)),  # V chunk
        ],
        out_specs=pl.BlockSpec((1, tq, D), lambda b, qi, kv: (b, qi, 0)),
        scratch_shapes=[
            pltpu.VMEM((tq, D), jnp.float32),              # rotated queries
            pltpu.VMEM((tq, factor * D), jnp.float32),     # retention accumulator
            pltpu.VMEM((tq, n_heads), jnp.float32),        # per-head signed row-sums
        ],
        compiler_params=pltpu.CompilerParams(
            dimension_semantics=("parallel", "parallel", "arbitrary"),
            vmem_limit_bytes=vmem_limit),
        cost_estimate=cost,
    )(xw, wq, bq, wg, bg, wo, bo, rot, sin, cos, kr, v)
    return out


# -----------------------------------------------------------------------------
# Pure-JAX reference (mirrors the PyTorch forward exactly)
# -----------------------------------------------------------------------------
def reference(x, params, n_heads):
    B, T, D = x.shape
    factor = 2
    head_dim = D * factor // n_heads
    key_dim = D // n_heads
    scaling = key_dim ** (-0.5)

    sin, cos = _sincos(T, key_dim)
    mask = _decay_mask(T, n_heads)

    q = x @ params["wq"] + params["bq"][0]
    k = (x @ params["wk"] + params["bk"][0]) * scaling
    v = x @ params["wv"] + params["bv"][0]
    g = x @ params["wg"] + params["bg"][0]

    def split(t, hd):
        return t.reshape(B, T, n_heads, hd).transpose(0, 2, 1, 3)

    q = split(q, key_dim)
    k = split(k, key_dim)
    v = split(v, head_dim)

    def rot(t):
        x1 = t[..., ::2]
        x2 = t[..., 1::2]
        return jnp.stack((-x2, x1), axis=-1).reshape(t.shape)

    qr = q * cos[None, None] + rot(q) * sin[None, None]
    kr = k * cos[None, None] + rot(k) * sin[None, None]

    qk = jnp.einsum("bhtd,bhsd->bhts", qr, kr) * mask[None]
    qk = qk / jnp.maximum(jnp.abs(qk.sum(-1, keepdims=True)), 1.0)
    out = jnp.einsum("bhts,bhsd->bhtd", qk, v).transpose(0, 2, 1, 3)     # (B,T,H,hd)

    mu = out.mean(-1, keepdims=True)
    var = ((out - mu) ** 2).mean(-1, keepdims=True)
    out = (out - mu) / jnp.sqrt(var + 1e-5)
    out = out.reshape(B, T, n_heads * head_dim)
    out = jax.nn.silu(g) * out
    return out @ params["wo"] + params["bo"][0]


# -----------------------------------------------------------------------------
if __name__ == "__main__":
    B, T, D = 2, 16, 32
    n_heads = 4
    factor = 2

    key = jax.random.PRNGKey(0)
    ks = jax.random.split(key, 11)
    params = {
        "wq": jax.random.normal(ks[0], (D, D), jnp.float32) * 0.05,
        "bq": jax.random.normal(ks[1], (1, D), jnp.float32) * 0.01,
        "wk": jax.random.normal(ks[2], (D, D), jnp.float32) * 0.05,
        "bk": jax.random.normal(ks[3], (1, D), jnp.float32) * 0.01,
        "wv": jax.random.normal(ks[4], (D, factor * D), jnp.float32) * 0.05,
        "bv": jax.random.normal(ks[5], (1, factor * D), jnp.float32) * 0.01,
        "wg": jax.random.normal(ks[6], (D, factor * D), jnp.float32) * 0.05,
        "bg": jax.random.normal(ks[7], (1, factor * D), jnp.float32) * 0.01,
        "wo": jax.random.normal(ks[8], (factor * D, D), jnp.float32) * 0.05,
        "bo": jax.random.normal(ks[9], (1, D), jnp.float32) * 0.01,
    }
    x = jax.random.normal(ks[10], (B, T, D), jnp.float32)

    ref = jax.block_until_ready(reference(x, params, n_heads))

    def run(compute_dtype):
        try:
            return jax.block_until_ready(
                multi_scale_retention(x, params, n_heads,
                                      compute_dtype=compute_dtype))
        except Exception:
            # Fallback for JAX versions without BlockSpec(pipeline_mode=...) /
            # pl.Buffered(1) single-buffering support.
            return jax.block_until_ready(
                multi_scale_retention(x, params, n_heads,
                                      compute_dtype=compute_dtype,
                                      single_buffer_consts=False))

    # Strict numerical check: f32 MXU operands end-to-end.
    out_f32 = run(jnp.float32)
    np.testing.assert_allclose(np.asarray(out_f32), np.asarray(ref),
                               rtol=5e-3, atol=5e-3)

    # Production configuration: bf16 MXU operands, f32 accumulation / statistics.
    out_bf16 = run(jnp.bfloat16)
    np.testing.assert_allclose(np.asarray(out_bf16), np.asarray(ref),
                               rtol=1e-1, atol=1e-1)

    print("KERNEL_OK")
</pallas_src>

<mosaic_0001>
module attributes {stable_mosaic.version = 11 : i64} {
  func.func @kv_prepass_kernel(%arg0: i32, %arg1: i32, %arg2: memref<1x16x32xf32, #tpu.memory_space<vmem>>, %arg3: memref<32x32xf32, #tpu.memory_space<vmem>>, %arg4: memref<1x32xf32, #tpu.memory_space<vmem>>, %arg5: memref<32x64xf32, #tpu.memory_space<vmem>>, %arg6: memref<1x64xf32, #tpu.memory_space<vmem>>, %arg7: memref<8x8xf32, #tpu.memory_space<vmem>>, %arg8: memref<16x8xf32, #tpu.memory_space<vmem>>, %arg9: memref<16x8xf32, #tpu.memory_space<vmem>>, %arg10: memref<1x16x32xf32, #tpu.memory_space<vmem>>, %arg11: memref<1x16x64xf32, #tpu.memory_space<vmem>>) attributes {dimension_semantics = [#tpu.dimension_semantics<parallel>, #tpu.dimension_semantics<parallel>], iteration_bounds = array<i64: 2, 1>, scalar_prefetch = 0 : i64, scratch_operands = 0 : i64, tpu.core_type = #tpu.core_type<tc>, window_params = [{transform_indices = @transform_0, window_bounds = array<i64: 1, 16, 32>}, {pipeline_mode = #tpu.pipeline_mode<synchronous>, transform_indices = @transform_1, window_bounds = array<i64: 32, 32>}, {pipeline_mode = #tpu.pipeline_mode<synchronous>, transform_indices = @transform_2, window_bounds = array<i64: 1, 32>}, {pipeline_mode = #tpu.pipeline_mode<synchronous>, transform_indices = @transform_3, window_bounds = array<i64: 32, 64>}, {pipeline_mode = #tpu.pipeline_mode<synchronous>, transform_indices = @transform_4, window_bounds = array<i64: 1, 64>}, {pipeline_mode = #tpu.pipeline_mode<synchronous>, transform_indices = @transform_5, window_bounds = array<i64: 8, 8>}, {transform_indices = @transform_6, window_bounds = array<i64: 16, 8>}, {transform_indices = @transform_7, window_bounds = array<i64: 16, 8>}, {transform_indices = @transform_8, window_bounds = array<i64: 1, 16, 32>}, {transform_indices = @transform_9, window_bounds = array<i64: 1, 16, 64>}]} {
    %c0 = arith.constant 0 : index
    %c0_0 = arith.constant 0 : index
    %c0_1 = arith.constant 0 : index
    %0 = vector.load %arg2[%c0, %c0_0, %c0_1] : memref<1x16x32xf32, #tpu.memory_space<vmem>>, vector<1x16x32xf32>
    %1 = vector.shape_cast %0 : vector<1x16x32xf32> to vector<16x32xf32>
    %c0_2 = arith.constant 0 : index
    %c0_3 = arith.constant 0 : index
    %2 = vector.load %arg3[%c0_2, %c0_3] : memref<32x32xf32, #tpu.memory_space<vmem>>, vector<32x32xf32>
    %cst = arith.constant dense<0.000000e+00> : vector<16x32xf32>
    %3 = tpu.matmul %1, %2, %cst {dimension_numbers = #tpu.dot_dimension_numbers<[1], [0], [0], [1], [0, 0, 1, 1], [], []>} : vector<16x32xf32>, vector<32x32xf32>, vector<16x32xf32> -> vector<16x32xf32>
    %c0_4 = arith.constant 0 : index
    %c0_5 = arith.constant 0 : index
    %4 = vector.load %arg4[%c0_4, %c0_5] : memref<1x32xf32, #tpu.memory_space<vmem>>, vector<1x32xf32>
    %5 = vector.broadcast %4 : vector<1x32xf32> to vector<16x32xf32>
    %6 = arith.addf %3, %5 : vector<16x32xf32>
    %cst_6 = arith.constant 0.353553385 : f32
    %7 = vector.broadcast %cst_6 : f32 to vector<16x32xf32>
    %8 = arith.mulf %6, %7 : vector<16x32xf32>
    %c0_7 = arith.constant 0 : index
    %c0_8 = arith.constant 0 : index
    %9 = vector.load %arg5[%c0_7, %c0_8] : memref<32x64xf32, #tpu.memory_space<vmem>>, vector<32x64xf32>
    %cst_9 = arith.constant dense<0.000000e+00> : vector<16x64xf32>
    %10 = tpu.matmul %1, %9, %cst_9 {dimension_numbers = #tpu.dot_dimension_numbers<[1], [0], [0], [1], [0, 0, 1, 1], [], []>} : vector<16x32xf32>, vector<32x64xf32>, vector<16x64xf32> -> vector<16x64xf32>
    %c0_10 = arith.constant 0 : index
    %c0_11 = arith.constant 0 : index
    %11 = vector.load %arg6[%c0_10, %c0_11] : memref<1x64xf32, #tpu.memory_space<vmem>>, vector<1x64xf32>
    %12 = vector.broadcast %11 : vector<1x64xf32> to vector<16x64xf32>
    %13 = arith.addf %10, %12 : vector<16x64xf32>
    %c0_12 = arith.constant 0 : index
    %c0_13 = arith.constant 0 : index
    %14 = vector.load %arg8[%c0_12, %c0_13] : memref<16x8xf32, #tpu.memory_space<vmem>>, vector<16x8xf32>
    %c0_14 = arith.constant 0 : index
    %c0_15 = arith.constant 0 : index
    %15 = vector.load %arg9[%c0_14, %c0_15] : memref<16x8xf32, #tpu.memory_space<vmem>>, vector<16x8xf32>
    %16 = vector.extract_strided_slice %8 {offsets = [0, 0], sizes = [16, 8], strides = [1, 1]} : vector<16x32xf32> to vector<16x8xf32>
    %c0_16 = arith.constant 0 : index
    %c0_17 = arith.constant 0 : index
    %17 = vector.load %arg7[%c0_16, %c0_17] : memref<8x8xf32, #tpu.memory_space<vmem>>, vector<8x8xf32>
    %cst_18 = arith.constant dense<0.000000e+00> : vector<16x8xf32>
    %18 = tpu.matmul %16, %17, %cst_18 {dimension_numbers = #tpu.dot_dimension_numbers<[1], [0], [0], [1], [0, 0, 1, 1], [], []>} : vector<16x8xf32>, vector<8x8xf32>, vector<16x8xf32> -> vector<16x8xf32>
    %19 = arith.mulf %16, %15 : vector<16x8xf32>
    %20 = arith.mulf %18, %14 : vector<16x8xf32>
    %21 = arith.addf %19, %20 : vector<16x8xf32>
    %c0_19 = arith.constant 0 : index
    %c0_20 = arith.constant 0 : index
    %c0_21 = arith.constant 0 : index
    %22 = vector.load %arg10[%c0_19, %c0_20, %c0_21] : memref<1x16x32xf32, #tpu.memory_space<vmem>>, vector<1x16x8xf32>
    %23 = vector.shape_cast %22 : vector<1x16x8xf32> to vector<16x8xf32>
    %24 = vector.shape_cast %21 : vector<16x8xf32> to vector<1x16x8xf32>
    tpu.vector_store %arg10[%c0_19, %c0_20, %c0_21], %24 {strides = array<i32>} : memref<1x16x32xf32, #tpu.memory_space<vmem>>, vector<1x16x8xf32>,
    %25 = vector.extract_strided_slice %8 {offsets = [0, 8], sizes = [16, 8], strides = [1, 1]} : vector<16x32xf32> to vector<16x8xf32>
    %c0_22 = arith.constant 0 : index
    %c0_23 = arith.constant 0 : index
    %26 = vector.load %arg7[%c0_22, %c0_23] : memref<8x8xf32, #tpu.memory_space<vmem>>, vector<8x8xf32>
    %cst_24 = arith.constant dense<0.000000e+00> : vector<16x8xf32>
    %27 = tpu.matmul %25, %26, %cst_24 {dimension_numbers = #tpu.dot_dimension_numbers<[1], [0], [0], [1], [0, 0, 1, 1], [], []>} : vector<16x8xf32>, vector<8x8xf32>, vector<16x8xf32> -> vector<16x8xf32>
    %28 = arith.mulf %25, %15 : vector<16x8xf32>
    %29 = arith.mulf %27, %14 : vector<16x8xf32>
    %30 = arith.addf %28, %29 : vector<16x8xf32>
    %c0_25 = arith.constant 0 : index
    %c0_26 = arith.constant 0 : index
    %c8 = arith.constant 8 : index
    %31 = vector.load %arg10[%c0_25, %c0_26, %c8] : memref<1x16x32xf32, #tpu.memory_space<vmem>>, vector<1x16x8xf32>
    %32 = vector.shape_cast %31 : vector<1x16x8xf32> to vector<16x8xf32>
    %33 = vector.shape_cast %30 : vector<16x8xf32> to vector<1x16x8xf32>
    tpu.vector_store %arg10[%c0_25, %c0_26, %c8], %33 {strides = array<i32>} : memref<1x16x32xf32, #tpu.memory_space<vmem>>, vector<1x16x8xf32>,
    %34 = vector.extract_strided_slice %8 {offsets = [0, 16], sizes = [16, 8], strides = [1, 1]} : vector<16x32xf32> to vector<16x8xf32>
    %c0_27 = arith.constant 0 : index
    %c0_28 = arith.constant 0 : index
    %35 = vector.load %arg7[%c0_27, %c0_28] : memref<8x8xf32, #tpu.memory_space<vmem>>, vector<8x8xf32>
    %cst_29 = arith.constant dense<0.000000e+00> : vector<16x8xf32>
    %36 = tpu.matmul %34, %35, %cst_29 {dimension_numbers = #tpu.dot_dimension_numbers<[1], [0], [0], [1], [0, 0, 1, 1], [], []>} : vector<16x8xf32>, vector<8x8xf32>, vector<16x8xf32> -> vector<16x8xf32>
    %37 = arith.mulf %34, %15 : vector<16x8xf32>
    %38 = arith.mulf %36, %14 : vector<16x8xf32>
    %39 = arith.addf %37, %38 : vector<16x8xf32>
    %c0_30 = arith.constant 0 : index
    %c0_31 = arith.constant 0 : index
    %c16 = arith.constant 16 : index
    %40 = vector.load %arg10[%c0_30, %c0_31, %c16] : memref<1x16x32xf32, #tpu.memory_space<vmem>>, vector<1x16x8xf32>
    %41 = vector.shape_cast %40 : vector<1x16x8xf32> to vector<16x8xf32>
    %42 = vector.shape_cast %39 : vector<16x8xf32> to vector<1x16x8xf32>
    tpu.vector_store %arg10[%c0_30, %c0_31, %c16], %42 {strides = array<i32>} : memref<1x16x32xf32, #tpu.memory_space<vmem>>, vector<1x16x8xf32>,
    %43 = vector.extract_strided_slice %8 {offsets = [0, 24], sizes = [16, 8], strides = [1, 1]} : vector<16x32xf32> to vector<16x8xf32>
    %c0_32 = arith.constant 0 : index
    %c0_33 = arith.constant 0 : index
    %44 = vector.load %arg7[%c0_32, %c0_33] : memref<8x8xf32, #tpu.memory_space<vmem>>, vector<8x8xf32>
    %cst_34 = arith.constant dense<0.000000e+00> : vector<16x8xf32>
    %45 = tpu.matmul %43, %44, %cst_34 {dimension_numbers = #tpu.dot_dimension_numbers<[1], [0], [0], [1], [0, 0, 1, 1], [], []>} : vector<16x8xf32>, vector<8x8xf32>, vector<16x8xf32> -> vector<16x8xf32>
    %46 = arith.mulf %43, %15 : vector<16x8xf32>
    %47 = arith.mulf %45, %14 : vector<16x8xf32>
    %48 = arith.addf %46, %47 : vector<16x8xf32>
    %c0_35 = arith.constant 0 : index
    %c0_36 = arith.constant 0 : index
    %c24 = arith.constant 24 : index
    %49 = vector.load %arg10[%c0_35, %c0_36, %c24] : memref<1x16x32xf32, #tpu.memory_space<vmem>>, vector<1x16x8xf32>
    %50 = vector.shape_cast %49 : vector<1x16x8xf32> to vector<16x8xf32>
    %51 = vector.shape_cast %48 : vector<16x8xf32> to vector<1x16x8xf32>
    tpu.vector_store %arg10[%c0_35, %c0_36, %c24], %51 {strides = array<i32>} : memref<1x16x32xf32, #tpu.memory_space<vmem>>, vector<1x16x8xf32>,
    %c0_37 = arith.constant 0 : index
    %c0_38 = arith.constant 0 : index
    %c0_39 = arith.constant 0 : index
    %52 = vector.load %arg11[%c0_37, %c0_38, %c0_39] : memref<1x16x64xf32, #tpu.memory_space<vmem>>, vector<1x16x64xf32>
    %53 = vector.shape_cast %52 : vector<1x16x64xf32> to vector<16x64xf32>
    %54 = vector.shape_cast %13 : vector<16x64xf32> to vector<1x16x64xf32>
    tpu.vector_store %arg11[%c0_37, %c0_38, %c0_39], %54 {strides = array<i32>} : memref<1x16x64xf32, #tpu.memory_space<vmem>>, vector<1x16x64xf32>,
    return
  }
  func.func @transform_0(%arg0: i32, %arg1: i32) -> (i32, i32, i32) {
    %c0_i32 = arith.constant 0 : i32
    %c0_i32_0 = arith.constant 0 : i32
    return %arg0, %arg1, %c0_i32 : i32, i32, i32
  }
  func.func @transform_1(%arg0: i32, %arg1: i32) -> (i32, i32) {
    %c0_i32 = arith.constant 0 : i32
    %c0_i32_0 = arith.constant 0 : i32
    %c0_i32_1 = arith.constant 0 : i32
    return %c0_i32, %c0_i32_0 : i32, i32
  }
  func.func @transform_2(%arg0: i32, %arg1: i32) -> (i32, i32) {
    %c0_i32 = arith.constant 0 : i32
    %c0_i32_0 = arith.constant 0 : i32
    %c0_i32_1 = arith.constant 0 : i32
    return %c0_i32, %c0_i32_0 : i32, i32
  }
  func.func @transform_3(%arg0: i32, %arg1: i32) -> (i32, i32) {
    %c0_i32 = arith.constant 0 : i32
    %c0_i32_0 = arith.constant 0 : i32
    %c0_i32_1 = arith.constant 0 : i32
    return %c0_i32, %c0_i32_0 : i32, i32
  }
  func.func @transform_4(%arg0: i32, %arg1: i32) -> (i32, i32) {
    %c0_i32 = arith.constant 0 : i32
    %c0_i32_0 = arith.constant 0 : i32
    %c0_i32_1 = arith.constant 0 : i32
    return %c0_i32, %c0_i32_0 : i32, i32
  }
  func.func @transform_5(%arg0: i32, %arg1: i32) -> (i32, i32) {
    %c0_i32 = arith.constant 0 : i32
    %c0_i32_0 = arith.constant 0 : i32
    %c0_i32_1 = arith.constant 0 : i32
    return %c0_i32, %c0_i32_0 : i32, i32
  }
  func.func @transform_6(%arg0: i32, %arg1: i32) -> (i32, i32) {
    %c0_i32 = arith.constant 0 : i32
    %c0_i32_0 = arith.constant 0 : i32
    return %arg1, %c0_i32 : i32, i32
  }
  func.func @transform_7(%arg0: i32, %arg1: i32) -> (i32, i32) {
    %c0_i32 = arith.constant 0 : i32
    %c0_i32_0 = arith.constant 0 : i32
    return %arg1, %c0_i32 : i32, i32
  }
  func.func @transform_8(%arg0: i32, %arg1: i32) -> (i32, i32, i32) {
    %c0_i32 = arith.constant 0 : i32
    %c0_i32_0 = arith.constant 0 : i32
    return %arg0, %arg1, %c0_i32 : i32, i32, i32
  }
  func.func @transform_9(%arg0: i32, %arg1: i32) -> (i32, i32, i32) {
    %c0_i32 = arith.constant 0 : i32
    %c0_i32_0 = arith.constant 0 : i32
    return %arg0, %arg1, %c0_i32 : i32, i32, i32
  }
}

module attributes {stable_mosaic.version = 11 : i64} {
  func.func @kv_prepass_kernel(%arg0: i32, %arg1: i32, %arg2: memref<1x16x32xf32, #tpu.memory_space<vmem>>, %arg3: memref<32x32xf32, #tpu.memory_space<vmem>>, %arg4: memref<1x32xf32, #tpu.memory_space<vmem>>, %arg5: memref<32x64xf32, #tpu.memory_space<vmem>>, %arg6: memref<1x64xf32, #tpu.memory_space<vmem>>, %arg7: memref<8x8xf32, #tpu.memory_space<vmem>>, %arg8: memref<16x8xf32, #tpu.memory_space<vmem>>, %arg9: memref<16x8xf32, #tpu.memory_space<vmem>>, %arg10: memref<1x16x32xf32, #tpu.memory_space<vmem>>, %arg11: memref<1x16x64xf32, #tpu.memory_space<vmem>>) attributes {dimension_semantics = [#tpu.dimension_semantics<parallel>, #tpu.dimension_semantics<parallel>], iteration_bounds = array<i64: 2, 1>, scalar_prefetch = 0 : i64, scratch_operands = 0 : i64, tpu.core_type = #tpu.core_type<tc>, window_params = [{transform_indices = @transform_0, window_bounds = array<i64: 1, 16, 32>}, {pipeline_mode = #tpu.pipeline_mode<synchronous>, transform_indices = @transform_1, window_bounds = array<i64: 32, 32>}, {pipeline_mode = #tpu.pipeline_mode<synchronous>, transform_indices = @transform_2, window_bounds = array<i64: 1, 32>}, {pipeline_mode = #tpu.pipeline_mode<synchronous>, transform_indices = @transform_3, window_bounds = array<i64: 32, 64>}, {pipeline_mode = #tpu.pipeline_mode<synchronous>, transform_indices = @transform_4, window_bounds = array<i64: 1, 64>}, {pipeline_mode = #tpu.pipeline_mode<synchronous>, transform_indices = @transform_5, window_bounds = array<i64: 8, 8>}, {transform_indices = @transform_6, window_bounds = array<i64: 16, 8>}, {transform_indices = @transform_7, window_bounds = array<i64: 16, 8>}, {transform_indices = @transform_8, window_bounds = array<i64: 1, 16, 32>}, {transform_indices = @transform_9, window_bounds = array<i64: 1, 16, 64>}]} {
    %c0 = arith.constant 0 : index
    %c0_0 = arith.constant 0 : index
    %c0_1 = arith.constant 0 : index
    %0 = vector.load %arg2[%c0, %c0_0, %c0_1] : memref<1x16x32xf32, #tpu.memory_space<vmem>>, vector<1x16x32xf32>
    %1 = vector.shape_cast %0 : vector<1x16x32xf32> to vector<16x32xf32>
    %c0_2 = arith.constant 0 : index
    %c0_3 = arith.constant 0 : index
    %2 = vector.load %arg3[%c0_2, %c0_3] : memref<32x32xf32, #tpu.memory_space<vmem>>, vector<32x32xf32>
    %cst = arith.constant dense<0.000000e+00> : vector<16x32xf32>
    %3 = tpu.matmul %1, %2, %cst {dimension_numbers = #tpu.dot_dimension_numbers<[1], [0], [0], [1], [0, 0, 1, 1], [], []>} : vector<16x32xf32>, vector<32x32xf32>, vector<16x32xf32> -> vector<16x32xf32>
    %c0_4 = arith.constant 0 : index
    %c0_5 = arith.constant 0 : index
    %4 = vector.load %arg4[%c0_4, %c0_5] : memref<1x32xf32, #tpu.memory_space<vmem>>, vector<1x32xf32>
    %5 = vector.broadcast %4 : vector<1x32xf32> to vector<16x32xf32>
    %6 = arith.addf %3, %5 : vector<16x32xf32>
    %cst_6 = arith.constant 0.353553385 : f32
    %7 = vector.broadcast %cst_6 : f32 to vector<16x32xf32>
    %8 = arith.mulf %6, %7 : vector<16x32xf32>
    %c0_7 = arith.constant 0 : index
    %c0_8 = arith.constant 0 : index
    %9 = vector.load %arg5[%c0_7, %c0_8] : memref<32x64xf32, #tpu.memory_space<vmem>>, vector<32x64xf32>
    %cst_9 = arith.constant dense<0.000000e+00> : vector<16x64xf32>
    %10 = tpu.matmul %1, %9, %cst_9 {dimension_numbers = #tpu.dot_dimension_numbers<[1], [0], [0], [1], [0, 0, 1, 1], [], []>} : vector<16x32xf32>, vector<32x64xf32>, vector<16x64xf32> -> vector<16x64xf32>
    %c0_10 = arith.constant 0 : index
    %c0_11 = arith.constant 0 : index
    %11 = vector.load %arg6[%c0_10, %c0_11] : memref<1x64xf32, #tpu.memory_space<vmem>>, vector<1x64xf32>
    %12 = vector.broadcast %11 : vector<1x64xf32> to vector<16x64xf32>
    %13 = arith.addf %10, %12 : vector<16x64xf32>
    %c0_12 = arith.constant 0 : index
    %c0_13 = arith.constant 0 : index
    %14 = vector.load %arg8[%c0_12, %c0_13] : memref<16x8xf32, #tpu.memory_space<vmem>>, vector<16x8xf32>
    %c0_14 = arith.constant 0 : index
    %c0_15 = arith.constant 0 : index
    %15 = vector.load %arg9[%c0_14, %c0_15] : memref<16x8xf32, #tpu.memory_space<vmem>>, vector<16x8xf32>
    %16 = vector.extract_strided_slice %8 {offsets = [0, 0], sizes = [16, 8], strides = [1, 1]} : vector<16x32xf32> to vector<16x8xf32>
    %c0_16 = arith.constant 0 : index
    %c0_17 = arith.constant 0 : index
    %17 = vector.load %arg7[%c0_16, %c0_17] : memref<8x8xf32, #tpu.memory_space<vmem>>, vector<8x8xf32>
    %cst_18 = arith.constant dense<0.000000e+00> : vector<16x8xf32>
    %18 = tpu.matmul %16, %17, %cst_18 {dimension_numbers = #tpu.dot_dimension_numbers<[1], [0], [0], [1], [0, 0, 1, 1], [], []>} : vector<16x8xf32>, vector<8x8xf32>, vector<16x8xf32> -> vector<16x8xf32>
    %19 = arith.mulf %16, %15 : vector<16x8xf32>
    %20 = arith.mulf %18, %14 : vector<16x8xf32>
    %21 = arith.addf %19, %20 : vector<16x8xf32>
    %c0_19 = arith.constant 0 : index
    %c0_20 = arith.constant 0 : index
    %c0_21 = arith.constant 0 : index
    %22 = vector.load %arg10[%c0_19, %c0_20, %c0_21] : memref<1x16x32xf32, #tpu.memory_space<vmem>>, vector<1x16x8xf32>
    %23 = vector.shape_cast %22 : vector<1x16x8xf32> to vector<16x8xf32>
    %24 = vector.shape_cast %21 : vector<16x8xf32> to vector<1x16x8xf32>
    tpu.vector_store %arg10[%c0_19, %c0_20, %c0_21], %24 {strides = array<i32>} : memref<1x16x32xf32, #tpu.memory_space<vmem>>, vector<1x16x8xf32>,
    %25 = vector.extract_strided_slice %8 {offsets = [0, 8], sizes = [16, 8], strides = [1, 1]} : vector<16x32xf32> to vector<16x8xf32>
    %c0_22 = arith.constant 0 : index
    %c0_23 = arith.constant 0 : index
    %26 = vector.load %arg7[%c0_22, %c0_23] : memref<8x8xf32, #tpu.memory_space<vmem>>, vector<8x8xf32>
    %cst_24 = arith.constant dense<0.000000e+00> : vector<16x8xf32>
    %27 = tpu.matmul %25, %26, %cst_24 {dimension_numbers = #tpu.dot_dimension_numbers<[1], [0], [0], [1], [0, 0, 1, 1], [], []>} : vector<16x8xf32>, vector<8x8xf32>, vector<16x8xf32> -> vector<16x8xf32>
    %28 = arith.mulf %25, %15 : vector<16x8xf32>
    %29 = arith.mulf %27, %14 : vector<16x8xf32>
    %30 = arith.addf %28, %29 : vector<16x8xf32>
    %c0_25 = arith.constant 0 : index
    %c0_26 = arith.constant 0 : index
    %c8 = arith.constant 8 : index
    %31 = vector.load %arg10[%c0_25, %c0_26, %c8] : memref<1x16x32xf32, #tpu.memory_space<vmem>>, vector<1x16x8xf32>
    %32 = vector.shape_cast %31 : vector<1x16x8xf32> to vector<16x8xf32>
    %33 = vector.shape_cast %30 : vector<16x8xf32> to vector<1x16x8xf32>
    tpu.vector_store %arg10[%c0_25, %c0_26, %c8], %33 {strides = array<i32>} : memref<1x16x32xf32, #tpu.memory_space<vmem>>, vector<1x16x8xf32>,
    %34 = vector.extract_strided_slice %8 {offsets = [0, 16], sizes = [16, 8], strides = [1, 1]} : vector<16x32xf32> to vector<16x8xf32>
    %c0_27 = arith.constant 0 : index
    %c0_28 = arith.constant 0 : index
    %35 = vector.load %arg7[%c0_27, %c0_28] : memref<8x8xf32, #tpu.memory_space<vmem>>, vector<8x8xf32>
    %cst_29 = arith.constant dense<0.000000e+00> : vector<16x8xf32>
    %36 = tpu.matmul %34, %35, %cst_29 {dimension_numbers = #tpu.dot_dimension_numbers<[1], [0], [0], [1], [0, 0, 1, 1], [], []>} : vector<16x8xf32>, vector<8x8xf32>, vector<16x8xf32> -> vector<16x8xf32>
    %37 = arith.mulf %34, %15 : vector<16x8xf32>
    %38 = arith.mulf %36, %14 : vector<16x8xf32>
    %39 = arith.addf %37, %38 : vector<16x8xf32>
    %c0_30 = arith.constant 0 : index
    %c0_31 = arith.constant 0 : index
    %c16 = arith.constant 16 : index
    %40 = vector.load %arg10[%c0_30, %c0_31, %c16] : memref<1x16x32xf32, #tpu.memory_space<vmem>>, vector<1x16x8xf32>
    %41 = vector.shape_cast %40 : vector<1x16x8xf32> to vector<16x8xf32>
    %42 = vector.shape_cast %39 : vector<16x8xf32> to vector<1x16x8xf32>
    tpu.vector_store %arg10[%c0_30, %c0_31, %c16], %42 {strides = array<i32>} : memref<1x16x32xf32, #tpu.memory_space<vmem>>, vector<1x16x8xf32>,
    %43 = vector.extract_strided_slice %8 {offsets = [0, 24], sizes = [16, 8], strides = [1, 1]} : vector<16x32xf32> to vector<16x8xf32>
    %c0_32 = arith.constant 0 : index
    %c0_33 = arith.constant 0 : index
    %44 = vector.load %arg7[%c0_32, %c0_33] : memref<8x8xf32, #tpu.memory_space<vmem>>, vector<8x8xf32>
    %cst_34 = arith.constant dense<0.000000e+00> : vector<16x8xf32>
    %45 = tpu.matmul %43, %44, %cst_34 {dimension_numbers = #tpu.dot_dimension_numbers<[1], [0], [0], [1], [0, 0, 1, 1], [], []>} : vector<16x8xf32>, vector<8x8xf32>, vector<16x8xf32> -> vector<16x8xf32>
    %46 = arith.mulf %43, %15 : vector<16x8xf32>
    %47 = arith.mulf %45, %14 : vector<16x8xf32>
    %48 = arith.addf %46, %47 : vector<16x8xf32>
    %c0_35 = arith.constant 0 : index
    %c0_36 = arith.constant 0 : index
    %c24 = arith.constant 24 : index
    %49 = vector.load %arg10[%c0_35, %c0_36, %c24] : memref<1x16x32xf32, #tpu.memory_space<vmem>>, vector<1x16x8xf32>
    %50 = vector.shape_cast %49 : vector<1x16x8xf32> to vector<16x8xf32>
    %51 = vector.shape_cast %48 : vector<16x8xf32> to vector<1x16x8xf32>
    tpu.vector_store %arg10[%c0_35, %c0_36, %c24], %51 {strides = array<i32>} : memref<1x16x32xf32, #tpu.memory_space<vmem>>, vector<1x16x8xf32>,
    %c0_37 = arith.constant 0 : index
    %c0_38 = arith.constant 0 : index
    %c0_39 = arith.constant 0 : index
    %52 = vector.load %arg11[%c0_37, %c0_38, %c0_39] : memref<1x16x64xf32, #tpu.memory_space<vmem>>, vector<1x16x64xf32>
    %53 = vector.shape_cast %52 : vector<1x16x64xf32> to vector<16x64xf32>
    %54 = vector.shape_cast %13 : vector<16x64xf32> to vector<1x16x64xf32>
    tpu.vector_store %arg11[%c0_37, %c0_38, %c0_39], %54 {strides = array<i32>} : memref<1x16x64xf32, #tpu.memory_space<vmem>>, vector<1x16x64xf32>,
    return
  }
  func.func @transform_0(%arg0: i32, %arg1: i32) -> (i32, i32, i32) {
    %c0_i32 = arith.constant 0 : i32
    %c0_i32_0 = arith.constant 0 : i32
    return %arg0, %arg1, %c0_i32 : i32, i32, i32
  }
  func.func @transform_1(%arg0: i32, %arg1: i32) -> (i32, i32) {
    %c0_i32 = arith.constant 0 : i32
    %c0_i32_0 = arith.constant 0 : i32
    %c0_i32_1 = arith.constant 0 : i32
    return %c0_i32, %c0_i32_0 : i32, i32
  }
  func.func @transform_2(%arg0: i32, %arg1: i32) -> (i32, i32) {
    %c0_i32 = arith.constant 0 : i32
    %c0_i32_0 = arith.constant 0 : i32
    %c0_i32_1 = arith.constant 0 : i32
    return %c0_i32, %c0_i32_0 : i32, i32
  }
  func.func @transform_3(%arg0: i32, %arg1: i32) -> (i32, i32) {
    %c0_i32 = arith.constant 0 : i32
    %c0_i32_0 = arith.constant 0 : i32
    %c0_i32_1 = arith.constant 0 : i32
    return %c0_i32, %c0_i32_0 : i32, i32
  }
  func.func @transform_4(%arg0: i32, %arg1: i32) -> (i32, i32) {
    %c0_i32 = arith.constant 0 : i32
    %c0_i32_0 = arith.constant 0 : i32
    %c0_i32_1 = arith.constant 0 : i32
    return %c0_i32, %c0_i32_0 : i32, i32
  }
  func.func @transform_5(%arg0: i32, %arg1: i32) -> (i32, i32) {
    %c0_i32 = arith.constant 0 : i32
    %c0_i32_0 = arith.constant 0 : i32
    %c0_i32_1 = arith.constant 0 : i32
    return %c0_i32, %c0_i32_0 : i32, i32
  }
  func.func @transform_6(%arg0: i32, %arg1: i32) -> (i32, i32) {
    %c0_i32 = arith.constant 0 : i32
    %c0_i32_0 = arith.constant 0 : i32
    return %arg1, %c0_i32 : i32, i32
  }
  func.func @transform_7(%arg0: i32, %arg1: i32) -> (i32, i32) {
    %c0_i32 = arith.constant 0 : i32
    %c0_i32_0 = arith.constant 0 : i32
    return %arg1, %c0_i32 : i32, i32
  }
  func.func @transform_8(%arg0: i32, %arg1: i32) -> (i32, i32, i32) {
    %c0_i32 = arith.constant 0 : i32
    %c0_i32_0 = arith.constant 0 : i32
    return %arg0, %arg1, %c0_i32 : i32, i32, i32
  }
  func.func @transform_9(%arg0: i32, %arg1: i32) -> (i32, i32, i32) {
    %c0_i32 = arith.constant 0 : i32
    %c0_i32_0 = arith.constant 0 : i32
    return %arg0, %arg1, %c0_i32 : i32, i32, i32
  }
}

</mosaic_0001>

<bundles_post_ra>
// kernel: tpu_custom_call.1
= control target key start
LH: loop header
LB: loop body
LE: loop exit
PB: predicated region body
PF: predicated region fallthrough
CT: control target
= control target key end

     0   :  { %s2536_s0 = inlined_call_operand.hbm [shape: f32[2,16,32], index: 0, kind: input, shape index: {}]   ;;  %s2537_s1 = inlined_call_operand.hbm [shape: f32[32,32], index: 1, kind: input, shape index: {}]   ;;  %s2538_s2 = inlined_call_operand.hbm [shape: f32[1,32], index: 2, kind: input, shape index: {}]   ;;  %s2539_s3 = inlined_call_operand.hbm [shape: f32[32,64], index: 3, kind: input, shape index: {}]   ;;  %s2540_s4 = inlined_call_operand.hbm [shape: f32[1,64], index: 4, kind: input, shape index: {}]   ;;  %s2541_s5 = inlined_call_operand.hbm [shape: f32[8,8], index: 5, kind: input, shape index: {}]   ;;  %s2542_s6 = inlined_call_operand.hbm [shape: f32[16,8], index: 6, kind: input, shape index: {}]   ;;  %s2543_s7 = inlined_call_operand.hbm [shape: f32[16,8], index: 7, kind: input, shape index: {}]   ;;  %s2544_s8 = inlined_call_operand.hbm [shape: f32[2,16,32], index: 8, kind: output, shape index: {0}]   ;;  %s2545_s9 = inlined_call_operand.hbm [shape: f32[2,16,64], index: 9, kind: output, shape index: {1}]  }
   0x1   :  { %2563 = sst [smem:[#allocation27_spill]] %s2537_s1 }
   0x2   :  { %2564 = sst [smem:[#allocation28_spill]] %s2544_s8 }
   0x3   :  { %2565 = sst [smem:[#allocation29_spill]] %s2545_s9 }
   0x4   :  { %15 = vsyncpa [#allocation3], 0 }
   0x5   :  { %17 = vsyncpa [#allocation3 + $0x1], 0 }
   0x6   :  { %18 = vsyncpa [#allocation6], 0 }
   0x7   :  { %19 = vsyncpa [#allocation9], 0 }
   0x8   :  { %20 = vsyncpa [#allocation12], 0 }
   0x9   :  { %21 = vsyncpa [#allocation15], 0 }
   0xa   :  { %22 = vsyncpa [#allocation4], 0 }
   0xb   :  { %24 = vsyncpa [#allocation4 + $0x1], 0 }
   0xc   :  { %25 = vsyncpa [#allocation18], 0 }
   0xd   :  { %27 = vsyncpa [#allocation18 + $0x1], 0  ;;  %s2041_s30 = smov 0   ;;  %s2043_s10 = smov 0  }
   0xe   :  { %s2045_s11 = smov 0   ;;  %s2047_s12 = smov 0  }
   0xf   :  { %s2049_s13 = smov 0   ;;  %s2051_s14 = smov 0  }
  0x10 LB: > { %2566 = sst [smem:[#allocation26_spill]] %s1962_s12  ;;  %s2546_s15 = sadd.s32 4294967295, %s1970_s14   ;;  %s1970_s14 = sphi %s2051_s14, %s33_s14   ;;  %s1966_s13 = sphi %s2049_s13, %s2598_s13   ;;  %s1962_s12 = sphi %s2047_s12, %s2597_s12   ;;  %s1958_s11 = sphi %s2045_s11, %s2596_s11   ;;  %s1954_s10 = sphi %s2043_s10, %s2595_s10   ;;  %s1950_s30 = sphi %s2041_s30, %s2594_s30  }
  0x11   : > { %p1337_p0 = scmp.ge.s32.totalorder %s1970_s14, 1  ;;  %p2075_p1 = scmp.eq.s32.totalorder %s2546_s15, 0 }
  0x12   : > { %p291_p2 = scmp.lt.s32.totalorder %s1970_s14, 3  ;;  %s1972_s18 = smov [#allocation5]  }
  0x13   : > { %s2567_s16 = scalar_select %p2075_p1, 1, 0 }
  0x14   : > { %p2080_p3 = pnand %p1337_p0, %p291_p2  ;;  %s303_s19 = sshll.u32 %s1972_s18, 4  ;;  %s2084_s19 = int_to_ptr.vmem [resolvable:$true] %s303_s19 }
  0x15   : > { %s1973_s21 = smov [#allocation8]   ;;  %s1974_s23 = smov [#allocation11]  }
  0x16   : > { %s2568_s17 = scalar_select %p2080_p3, 1, 0 }
  0x17   : > { %p1501_p4 = pneg %p2080_p3  ;;  %s327_s22 = sshll.u32 %s1973_s21, 4  ;;  %s2095_s22 = int_to_ptr.vmem [resolvable:$true] %s327_s22 }
  0x18   : > { %s2097_s24 = sshll.u32 %s1974_s23, 4  ;;  %s2570_s1 = sld [smem:[#allocation27_spill]]  ;;  %s353_s24 = int_to_ptr.vmem [resolvable:$true] %s2097_s24 }
  0x19   : > { %p2091_p6 = pnand %p1501_p4, %p2075_p1 }
  0x1b   : > { %p2107_p8 = pneg %p2091_p6 }
  0x1e   : > { %s1614_s27 = scalar_lea.hbm %s2570_s1, 512 }
  0x1f   : > { %p1615_p7 = scmp.ne.s32.totalorder %s2570_s1, %s1614_s27  ;;  %p1621_p11 = scmp.lt.u32.totalorder %s1614_s27, %s2570_s1 }
  0x21   : > { %p1617_p9 = pnand %p2107_p8, %p1615_p7 }
  0x23   : > { %p1618_p10 = pneg %p1617_p9 }
  0x25   : > { %p1623_p12 = pnand %p1621_p11, %p1618_p10 }
  0x27   : > { %1626 = shalt.err (!%p1623_p12)
}
  0x28   : > { %s1627_s25 = scalar_lea.vmem %s2084_s19, 512  ;;  %p1635_p4 = scmp.lt.s32.totalorder %s2084_s19, %s2084_s19 }
  0x29   : > { %p1628_p13 = scmp.ne.s32.totalorder %s2084_s19, %s1627_s25  ;;  %p1636_p5 = scmp.lt.s32.totalorder %s1627_s25, %s1627_s25 }
  0x2b   : > { %p1630_p0 = pnand %p1628_p13, %p2107_p8  ;;  %p1637_p7 = por %p1636_p5, %p1635_p4 }
  0x2d   : > { %p1631_p2 = pneg %p1630_p0 }
  0x2f   : > { %p1638_p9 = pnand %p1637_p7, %p1631_p2 }
  0x31   : > { %1641 = shalt.err (!%p1638_p9)
}
  0x32   : > { %s2553_s26 = smov 128   ;;  %s2555_s27 = smov 8  }
  0x33   : > { %1504 = dma.hbm_to_vmem [thread:$0]  (!%p2091_p6), %s2570_s1, 512, %s2084_s19, [#allocation6], %s2553_s26, %s2553_s26, %s2555_s27  }
  0x34   : > { %s1642_s25 = scalar_lea.hbm %s2539_s3, 512 }
  0x35   : > { %p1643_p5 = scmp.ne.s32.totalorder %s2539_s3, %s1642_s25  ;;  %p1649_p12 = scmp.lt.u32.totalorder %s1642_s25, %s2539_s3 }
  0x37   : > { %p1645_p10 = pnand %p1643_p5, %p2107_p8 }
  0x39   : > { %p1646_p11 = pneg %p1645_p10 }
  0x3b   : > { %p1651_p13 = pnand %p1649_p12, %p1646_p11 }
  0x3d   : > { %1654 = shalt.err (!%p1651_p13)
}
  0x3e   : > { %s1655_s19 = scalar_lea.vmem %s2095_s22, 512  ;;  %p1663_p7 = scmp.lt.s32.totalorder %s2095_s22, %s2095_s22 }
  0x3f   : > { %p1656_p0 = scmp.ne.s32.totalorder %s2095_s22, %s1655_s19  ;;  %p1664_p9 = scmp.lt.s32.totalorder %s1655_s19, %s1655_s19 }
  0x41   : > { %p1658_p2 = pnand %p1656_p0, %p2107_p8  ;;  %p1665_p5 = por %p1664_p9, %p1663_p7 }
  0x43   : > { %p1659_p4 = pneg %p1658_p2 }
  0x45   : > { %p1666_p10 = pnand %p1665_p5, %p1659_p4 }
  0x47   : > { %1669 = shalt.err (!%p1666_p10)
}
  0x48   : > { %1510 = dma.hbm_to_vmem [thread:$0]  (!%p2091_p6), %s2539_s3, 512, %s2095_s22, [#allocation9], %s2553_s26, %s2553_s26, %s2555_s27  }
  0x49   : > { %s1670_s28 = scalar_lea.hbm %s2541_s5, 128 }
  0x4a   : > { %p1671_p11 = scmp.ne.s32.totalorder %s2541_s5, %s1670_s28  ;;  %p1677_p0 = scmp.lt.u32.totalorder %s1670_s28, %s2541_s5 }
  0x4c   : > { %p1673_p12 = pnand %p1671_p11, %p2107_p8 }
  0x4e   : > { %p1674_p13 = pneg %p1673_p12 }
  0x50   : > { %p1679_p2 = pnand %p1677_p0, %p1674_p13 }
  0x52   : > { %1682 = shalt.err (!%p1679_p2)
}
  0x53   : > { %s1683_s19 = scalar_lea.vmem %s353_s24, 128  ;;  %p1691_p5 = scmp.lt.s32.totalorder %s353_s24, %s353_s24 }
  0x54   : > { %p1684_p4 = scmp.ne.s32.totalorder %s353_s24, %s1683_s19  ;;  %p1692_p10 = scmp.lt.s32.totalorder %s1683_s19, %s1683_s19 }
  0x56   : > { %p1686_p7 = pnand %p1684_p4, %p2107_p8  ;;  %p1693_p3 = por %p1692_p10, %p1691_p5 }
  0x58   : > { %p1687_p9 = pneg %p1686_p7 }
  0x5a   : > { %p1694_p1 = pnand %p1693_p3, %p1687_p9 }
  0x5c   : > { %1697 = shalt.err (!%p1694_p1)
}
  0x5d   : > { %1516 = dma.hbm_to_vmem [thread:$0]  (!%p2091_p6), %s2541_s5, 128, %s353_s24, [#allocation12]  }
  0x5e   : > { %s1977_s9 = smov [#allocation7]   ;;  %s1978_s15 = smov [#allocation10]  }
  0x5f   : > { %s317_s12 = sshll.u32 %s1977_s9, 4  ;;  %s341_s28 = sshll.u32 %s1978_s15, 4  ;;  %s318_s12 = int_to_ptr.vmem [resolvable:$true] %s317_s12  ;;  %s342_s28 = int_to_ptr.vmem [resolvable:$true] %s341_s28 }
  0x60   : > { %s1698_s23 = scalar_lea.hbm %s2538_s2, 16 }
  0x61   : > { %p1699_p1 = scmp.ne.s32.totalorder %s2538_s2, %s1698_s23  ;;  %p1705_p12 = scmp.lt.u32.totalorder %s1698_s23, %s2538_s2 }
  0x63   : > { %p1701_p3 = pnand %p1699_p1, %p2107_p8 }
  0x65   : > { %p1702_p11 = pneg %p1701_p3 }
  0x67   : > { %p1707_p13 = pnand %p1705_p12, %p1702_p11 }
  0x69   : > { %1710 = shalt.err (!%p1707_p13)
}
  0x6a   : > { %s1711_s24 = scalar_lea.vmem %s318_s12, 16  ;;  %s1718_s8 = scalar_lea.vmem %s318_s12, 32 }
  0x6b   : > { %p1712_p0 = scmp.ne.s32.totalorder %s318_s12, %s1711_s24  ;;  %p1719_p7 = scmp.lt.s32.totalorder %s318_s12, %s318_s12 }
  0x6c   : > { %p1720_p9 = scmp.lt.s32.totalorder %s1718_s8, %s1711_s24 }
  0x6d   : > { %p1714_p2 = pnand %p1712_p0, %p2107_p8 }
  0x6e   : > { %p1721_p5 = por %p1720_p9, %p1719_p7 }
  0x6f   : > { %p1715_p4 = pneg %p1714_p2 }
  0x71   : > { %p1722_p10 = pnand %p1721_p5, %p1715_p4 }
  0x73   : > { %1725 = shalt.err (!%p1722_p10)
}
  0x74   : > { %1507 = dma.hbm_to_vmem [thread:$0]  (!%p2091_p6), %s2538_s2, 16, %s318_s12, [#allocation6]  }
  0x75   : > { %s1726_s21 = scalar_lea.hbm %s2540_s4, 16 }
  0x76   : > { %p1727_p1 = scmp.ne.s32.totalorder %s2540_s4, %s1726_s21  ;;  %p1733_p12 = scmp.lt.u32.totalorder %s1726_s21, %s2540_s4 }
  0x78   : > { %p1729_p3 = pnand %p1727_p1, %p2107_p8 }
  0x7a   : > { %p1730_p11 = pneg %p1729_p3 }
  0x7c   : > { %p1735_p13 = pnand %p1733_p12, %p1730_p11 }
  0x7e   : > { %1738 = shalt.err (!%p1735_p13)
}
  0x7f   : > { %s1739_s24 = scalar_lea.vmem %s342_s28, 16  ;;  %s1746_s12 = scalar_lea.vmem %s342_s28, 32 }
  0x80   : > { %p1740_p0 = scmp.ne.s32.totalorder %s342_s28, %s1739_s24  ;;  %p1747_p7 = scmp.lt.s32.totalorder %s342_s28, %s342_s28 }
  0x81   : > { %p1748_p9 = scmp.lt.s32.totalorder %s1746_s12, %s1739_s24 }
  0x82   : > { %p1742_p2 = pnand %p1740_p0, %p2107_p8 }
  0x83   : > { %p1749_p5 = por %p1748_p9, %p1747_p7 }
  0x84   : > { %p1743_p4 = pneg %p1742_p2 }
  0x86   : > { %p1750_p10 = pnand %p1749_p5, %p1743_p4 }
  0x88   : > { %1753 = shalt.err (!%p1750_p10)
}
  0x89   : > { %1513 = dma.hbm_to_vmem [thread:$0]  (!%p2091_p6), %s2540_s4, 16, %s342_s28, [#allocation9]  }
  0x8a   : > { %s1979_s15 = smov [#allocation13]   ;;  %s1980_s29 = smov [#allocation14]  }
  0x8b   : > { %s365_s26 = sshll.u32 %s1979_s15, 4  ;;  %s381_s21 = sshll.u32 %s1980_s29, 4  ;;  %s366_s26 = int_to_ptr.vmem [resolvable:$true] %s365_s26  ;;  %s382_s21 = int_to_ptr.vmem [resolvable:$true] %s381_s21 }
  0x8c   : > { %s1754_s19 = scalar_lea.hbm %s2542_s6, 256 }
  0x8d   : > { %p1755_p1 = scmp.ne.s32.totalorder %s2542_s6, %s1754_s19  ;;  %p1761_p12 = scmp.lt.u32.totalorder %s1754_s19, %s2542_s6 }
  0x8f   : > { %p1757_p3 = pnand %p1755_p1, %p2107_p8 }
  0x91   : > { %p1758_p11 = pneg %p1757_p3 }
  0x93   : > { %p1763_p13 = pnand %p1761_p12, %p1758_p11 }
  0x95   : > { %1766 = shalt.err (!%p1763_p13)
}
  0x96   : > { %s1767_s28 = scalar_lea.vmem %s366_s26, 256  ;;  %p1775_p7 = scmp.lt.s32.totalorder %s366_s26, %s366_s26 }
  0x97   : > { %p1768_p0 = scmp.ne.s32.totalorder %s366_s26, %s1767_s28  ;;  %p1776_p9 = scmp.lt.s32.totalorder %s1767_s28, %s1767_s28 }
  0x99   : > { %p1770_p2 = pnand %p1768_p0, %p2107_p8  ;;  %p1777_p5 = por %p1776_p9, %p1775_p7 }
  0x9b   : > { %p1771_p4 = pneg %p1770_p2 }
  0x9d   : > { %p1778_p10 = pnand %p1777_p5, %p1771_p4 }
  0x9f   : > { %1781 = shalt.err (!%p1778_p10)
}
  0xa0   : > { %s2572_s9 = smov 128   ;;  %s1782_s19 = scalar_lea.hbm %s2543_s7, 256 }
  0xa1   : > { %1519 = dma.hbm_to_vmem [thread:$0]  (!%p2091_p6), %s2542_s6, 256, %s366_s26, [#allocation12], %s2572_s9, %s2572_s9, %s2555_s27  }
  0xa2   : > { %p1783_p1 = scmp.ne.s32.totalorder %s2543_s7, %s1782_s19  ;;  %p1789_p12 = scmp.lt.u32.totalorder %s1782_s19, %s2543_s7 }
  0xa4   : > { %p1785_p3 = pnand %p1783_p1, %p2107_p8 }
  0xa6   : > { %p1786_p11 = pneg %p1785_p3 }
  0xa8   : > { %p1791_p13 = pnand %p1789_p12, %p1786_p11 }
  0xaa   : > { %1794 = shalt.err (!%p1791_p13)
}
  0xab   : > { %s1795_s28 = scalar_lea.vmem %s382_s21, 256  ;;  %p1803_p7 = scmp.lt.s32.totalorder %s382_s21, %s382_s21 }
  0xac   : > { %p1796_p0 = scmp.ne.s32.totalorder %s382_s21, %s1795_s28  ;;  %p1804_p9 = scmp.lt.s32.totalorder %s1795_s28, %s1795_s28 }
  0xae   : > { %p1798_p2 = pnand %p1796_p0, %p2107_p8  ;;  %p1805_p5 = por %p1804_p9, %p1803_p7 }
  0xb0   : > { %p1799_p4 = pneg %p1798_p2 }
  0xb2   : > { %p1806_p10 = pnand %p1805_p5, %p1799_p4 }
  0xb4   : > { %1809 = shalt.err (!%p1806_p10)
}
  0xb5   : > { %1522 = dma.hbm_to_vmem [thread:$0]  (!%p2091_p6), %s2543_s7, 256, %s382_s21, [#allocation15], %s2572_s9, %s2572_s9, %s2555_s27  }
  0xb6   : > { %s1336_s20 = sadd.s32 4294967294, %s1970_s14   ;;  %s45_s18 = sadd.s32 1, %s1966_s13 }
  0xb7   : > { %s54_s29 = sadd.s32 1, %s1958_s11  ;;  %p47_p8 = scmp.ge.s32.totalorder %s45_s18, 2 }
  0xb8   : > { %p61_p1 = scmp.ne.s32.totalorder %s1958_s11, %s1954_s10  ;;  %p62_p3 = scmp.eq.s32.totalorder %s1970_s14, 0 }
  0xb9   : > { %p67_p11 = scmp.ne.s32.totalorder %s1954_s10, %s1950_s30  ;;  %s2600_s18 = smov (%p47_p8, %s45_s18), 0 }
  0xba   : > { %p2264_p12 = por %p62_p3, %p61_p1  ;;  %p2574_p13 = scmp.ne.s32.totalorder %s2567_s16, 0 }
  0xbb   : > { %s49_s25 = ssub.s32 %s1966_s13, %s2600_s18  ;;  %s2576_s19 = sadd.s32 4294967295, %s1970_s14  }
  0xbc   : > { %p2270_p6 = por %p2574_p13, %p67_p11  ;;  %p250_p0 = scmp.eq.s32.totalorder %s2576_s19, 1 }
  0xbd   : > { %p52_p2 = scmp.eq.s32.totalorder %s49_s25, 0  ;;  %p256_p4 = scmp.eq.s32.totalorder %s1336_s20, 1 }
  0xbe   : > { %p2278_p7 = por %p250_p0, %p61_p1  ;;  %p1541_p9 = scmp.lt.s32.totalorder %s1970_s14, 2 }
  0xbf   : > { %s2284_s24 = scalar_select %p52_p2, %s1958_s11, %s54_s29  }
  0xc0   : > { %s2577_s22 = scalar_select %p2278_p7, 1, 0 }
  0xc1   : > { %p2286_p5 = por %p256_p4, %p67_p11  ;;  %s395_s8 = sand.u32 1, %s1958_s11  }
  0xc2   : > { %s1346_s28 = sshll.u32 %s395_s8, 4  ;;  %s1382_s26 = sshll.u32 %s1966_s13, 8 }
  0xc3   : > { %s2578_s12 = scalar_select %p2286_p5, 1, 0 }
  0xc4   : > { %s2295_s19 = scalar_lea.hbm %s2536_s0, %s1382_s26  ;;  %s399_s20 = scalar_lea.vmem [#allocation2], %s1346_s28 }
  0xc5   : > { %s408_s25 = sshll.u32 %s399_s20, 4  ;;  %p2301_p10 = pnand %p1541_p9, %p2264_p12  ;;  %s2297_s25 = int_to_ptr.vmem [resolvable:$true] %s408_s25 }
  0xc6   : > { %s2305_s1 = scalar_lea.sflag [#allocation3], %s395_s8  ;;  %s1810_s27 = scalar_lea.hbm %s2295_s19, 256 }
  0xc7   : > { %p1811_p8 = scmp.ne.s32.totalorder %s2295_s19, %s1810_s27  ;;  %p1812_p1 = pneg %p2301_p10 }
  0xc8   : > { %s1815_s23 = scalar_lea.hbm %s2536_s0, 512  ;;  %p1816_p12 = scmp.lt.u32.totalorder %s2295_s19, %s2536_s0 }
  0xc9   : > { %p1813_p3 = pnand %p1812_p1, %p1811_p8  ;;  %p1817_p13 = scmp.lt.u32.totalorder %s1815_s23, %s1810_s27 }
  0xca   : > { %p1819_p2 = scmp.lt.u32.totalorder %s1810_s27, %s2295_s19 }
  0xcb   : > { %p1814_p11 = pneg %p1813_p3  ;;  %p1818_p0 = por %p1817_p13, %p1816_p12 }
  0xcd   : > { %p1820_p4 = por %p1819_p2, %p1818_p0 }
  0xcf   : > { %p1821_p9 = pnand %p1820_p4, %p1814_p11 }
  0xd1   : > { %1824 = shalt.err (!%p1821_p9)
}
  0xd2   : > { %s1825_s8 = scalar_lea.vmem %s2297_s25, 256  ;;  %s1981_s28 = smov [#allocation2]  }
  0xd3   : > { %p1826_p8 = scmp.ne.s32.totalorder %s2297_s25, %s1825_s8  ;;  %s1830_s26 = sshll.u32 %s1981_s28, 4  ;;  %s1831_s26 = int_to_ptr.vmem [resolvable:$false] %s1830_s26 }
  0xd4   : > { %s1832_s15 = scalar_lea.vmem %s1831_s26, 512  ;;  %p1833_p7 = scmp.lt.s32.totalorder %s2297_s25, %s1831_s26 }
  0xd5   : > { %p1828_p3 = pnand %p1826_p8, %p1812_p1  ;;  %p1834_p12 = scmp.lt.s32.totalorder %s1832_s15, %s1825_s8 }
  0xd7   : > { %p1829_p5 = pneg %p1828_p3  ;;  %p1835_p13 = por %p1834_p12, %p1833_p7 }
  0xd9   : > { %p1836_p0 = pnand %p1835_p13, %p1829_p5 }
  0xdb   : > { %1839 = shalt.err (!%p1836_p0)
}
  0xdc   : > { %s2580_s27 = smov 8   ;;  %p2581_p1 = scmp.ne.s32.totalorder %s2568_s17, 0 }
  0xdd   : > { %1526 = dma.hbm_to_vmem [thread:$0]  (!%p2301_p10), %s2295_s19, 256, %s2297_s25, %s2305_s1, %s2572_s9, %s2572_s9, %s2580_s27  }
  0xde   : > { %420 = sbr.rel (%p2581_p1) target bundleno = 955 (0x3bb), region = 52  ;;  %s2339_s23 = sand.u32 (!%p2581_p1), 1, %s1954_s10  }
  0xdf   : > { %s2342_s20 = sshll.u32 (!%p2581_p1), %s2339_s23, 4  ;;  %s423_s29 = scalar_lea.sflag (!%p2581_p1), [#allocation3], %s2339_s23 }
  0xe0   : > { %s426_s8 = scalar_lea.vmem (!%p2581_p1), [#allocation2], %s2342_s20 }
  0xe5   : > { %1921 = dma.done.wait (%p2270_p6), %s423_s29, 256  }
  0xe6   : > { %1923 = vsyncadd (%p2270_p6), %s423_s29, 4294967040  ;;  %p2582_p7 = scmp.ne.s32.totalorder %s2567_s16, 0 }
  0xe8   : > { %1925 = dma.done.wait (%p2582_p7), [#allocation6], 528  }
  0xe9   : > { %1927 = vsyncadd (%p2582_p7), [#allocation6], 4294966768 }
  0xea   : > { %1929 = dma.done.wait (%p2582_p7), [#allocation9], 528  }
  0xeb   : > { %1931 = vsyncadd (%p2582_p7), [#allocation9], 4294966768 }
  0xec   : > { %1933 = dma.done.wait (%p2582_p7), [#allocation12], 384  }
  0xed   : > { %1935 = vsyncadd (%p2582_p7), [#allocation12], 4294966912 }
  0xee   : > { %1937 = dma.done.wait (%p2582_p7), [#allocation15], 256  }
  0xef   : > { %1939 = vsyncadd (%p2582_p7), [#allocation15], 4294967040  ;;  %vm512_vm0 = vcmask 261120   ;;  %v501_v0 = vld [vmem:[#allocation5] sm:$0xff]  ;;  %v502_v1 = vld [vmem:[#allocation5 + $0x8] sm:$0xff]  ;;  %vm687_vm1 = vcmask 64512  }
  0xf0   : > { %v503_v2 = vld [vmem:[#allocation5 + $0x10] sm:$0xff]  ;;  %v1451_v3 = vpack.c.bf16 %v502_v1, %v501_v0  ;;  %v504_v4 = vld [vmem:[#allocation5 + $0x18] sm:$0xff]  ;;  %v2369_v8 = vld [vmem:[#allocation11] sm:$0xff]  ;;  %s1982_s1 = smov 112   ;;  %s1983_s16 = smov 120   ;;  %vm1100_vm2 = vcmask 523264  }
  0xf1   : > { %v499_v5 = vld [vmem:[%s426_s8] sm:$0xff]  ;;  %v1455_v6 = vpack.c.bf16 %v504_v4, %v503_v2  ;;  %v500_v7 = vld [vmem:[%s426_s8 + $0x8] sm:$0xff]  ;;  %s1984_s17 = smov 104   ;;  %s1985_s9 = smov 8  }
  0xf2   : > { %1417 = vmatprep.mubr.msk.f32.mxu0 %vm512_vm0, %v499_v5  ;;  %1428 = vmatprep.mubr.msk.f32.mxu1 %vm512_vm0, %v499_v5  ;;  %v596_v9 = vld [vmem:[#allocation8] sm:$0xff]  ;;  %v597_v10 = vld [vmem:[#allocation8 + $0x8] sm:$0xff]  ;;  %v598_v11 = vld [vmem:[#allocation8 + $0x10] sm:$0xff]  ;;  %s2559_s21 = smov 16   ;;  %s2557_s19 = smov 24  }
  0xf3   : > { %1452 = vmatprep.subr.bf16.mxu0 %v1451_v3  ;;  %v1459_v12 = vpack.c.bf16 %v597_v10, %v596_v9  ;;  %v599_v13 = vld [vmem:[#allocation8 + $0x18] sm:$0xff]  ;;  %v685_v22 = vld [vmem:[#allocation14 + $0x8] sm:$0xff]  ;;  %v1363_v24 = vld [vmem:[#allocation10] ss:$0 sm:$0xff]  ;;  %s2400_s25 = scalar_lea.vmem [#allocation17], %s2342_s20  ;;  %s2583_s28 = sld [smem:[#allocation26_spill]] }
  0xf4   : > { %1454 = vmatpush3.bf16.msra.mxu0 %v1451_v3  ;;  %v1463_v14 = vpack.c.bf16 %v599_v13, %v598_v11  ;;  %v1360_v15 = vld [vmem:[#allocation7] ss:$0 sm:$0xff]  ;;  %v683_v35 = vld [vmem:[#allocation13 + $0x8] sm:$0xff]  ;;  %v682_v36 = vld [vmem:[#allocation13] sm:$0xff]  ;;  %s2414_s26 = scalar_lea.vmem [#allocation16], %s2342_s20  ;;  %s1142_s15 = sshll.u32 %s2400_s25, 4  ;;  %s2422_s15 = int_to_ptr.vmem [resolvable:$true] %s1142_s15 }
  0xf5   : > { %1456 = vmatprep.subr.bf16.mxu0 %v1455_v6  ;;  %1460 = vmatprep.subr.bf16.mxu1 %v1459_v12  ;;  %v684_v23 = vld [vmem:[#allocation14] sm:$0xff]  ;;  %s2584_s8 = sld [smem:[#allocation29_spill]]  ;;  %p2585_p5 = scmp.ne.s32.totalorder %s2577_s22, 0 }
  0xf6   : > { %1462 = vmatpush3.bf16.msra.mxu1 %v1459_v12 }
  0xf7   : > { %1464 = vmatprep.subr.bf16.mxu1 %v1463_v14 }
  0xf8   : > { %1458 = vmatpush3.bf16.msra.mxu0 %v1455_v6 }
  0xf9   : > { %1431 = vmatprep.subr.mxu0 %v2369_v8  ;;  %s2561_s27 = sshll.u32 %s2583_s28, 8 }
  0xfa   : > { %1466 = vmatpush3.bf16.msra.mxu1 %v1463_v14 }
  0xfb   : > { %1418 = vmatmul.mubr.msk.f32.vlgmr.msra.gmra.mrb[0].mxu0 %vm512_vm0, %v500_v7  ;;  %1436 = vmatprep.subr.mxu1 %v2369_v8 }
  0xfc   : > { %1432 = vmatpush3.msra.mxu0 %v2369_v8 }
  0xfd   : > { %1441 = vmatprep.subr.mxu0 %v2369_v8  ;;  %1429 = vmatmul.mubr.msk.f32.vlgmr.msra.gmra.mrb[0].mxu1 %vm512_vm0, %v500_v7 }
  0xfe   : > { %1437 = vmatpush3.msra.mxu1 %v2369_v8 }
  0xff   : > { %1446 = vmatprep.subr.mxu1 %v2369_v8 }
 0x1ce   : > { %v1419_v16 = vpop.f32.mrb[0].mxu0 }
 0x1cf   : > { %v591_v17 = vadd.f32 %v1419_v16, %v1360_v15  ;;  %v585_v18 = vpop.f32.mrb[1].mxu0 }
 0x1d0   : > { %v586_v19 = vadd.f32 %v1360_v15, %v585_v18  ;;  %v1430_v27 = vpop.f32.mrb[0].mxu1 }
 0x1d1   : > { %v2378_v20 = vmul.f32 0.35355338, %v591_v17  ;;  %v679_v28 = vadd.f32 %v1430_v27, %v1363_v24  ;;  %v673_v29 = vpop.f32.mrb[1].mxu1 }
 0x1d2   : > { %v2380_v21 = vmul.f32 0.35355338, %v586_v19  ;;  %v674_v30 = vadd.f32 %v1363_v24, %v673_v29 }
 0x1d3   : > { %889 = vrot.lane.b32.xlu1 %v2378_v20, %s1982_s1  ;;  %780 = vrot.lane.b32.xlu0 %v2378_v20, %s1983_s16  ;;  %1102 = vst.msk [vmem:[%s2400_s25 + $0x8] sm:$0xff] %vm1100_vm2, %v679_v28  ;;  %v770_v38 = vmul.f32 %v685_v22, %v2378_v20 }
 0x1d4   : > { %1433 = vmatprep.mubr.msk.f32.mxu0 %vm687_vm1, %v2380_v21  ;;  %1101 = vst.msk [vmem:[%s2400_s25] sm:$0xff] %vm1100_vm2, %v674_v30  ;;  %v769_v41 = vmul.f32 %v684_v23, %v2380_v21  ;;  %s1988_s25 = smov [#allocation17]  }
 0x1d5   : > { %1434 = vmatmul.mubr.msk.f32.vlgmr.msra.gmra.mrb[2].mxu0 %vm687_vm1, %v2378_v20 }
 0x1d6   : > { %1442 = vmatpush3.msra.mxu0 %v2369_v8 }
 0x1d7   : > { %887 = vrot.lane.b32.xlu1 %v2380_v21, %s1982_s1  ;;  %778 = vrot.lane.b32.xlu0 %v2380_v21, %s1983_s16  ;;  %s2430_s1 = scalar_lea.hbm %s2584_s8, %s2561_s27 }
 0x1db   : > { %996 = vrot.lane.b32.xlu1 %v2378_v20, %s1984_s17  ;;  %994 = vrot.lane.b32.xlu0 %v2380_v21, %s1984_s17  ;;  %s1840_s17 = scalar_lea.vmem %s2422_s15, 256 }
 0x1dc   : > { %p1841_p6 = scmp.ne.s32.totalorder %s2422_s15, %s1840_s17 }
 0x1de   : > { %p1842_p10 = pnand %p1841_p6, %p2585_p5 }
 0x1df   : > { %865 = vrot.lane.b32.xlu1 %v685_v22, %s1985_s9  ;;  %863 = vrot.lane.b32.xlu0 %v684_v23, %s1985_s9 }
 0x1e0   : > { %p1843_p11 = pneg %p1842_p10 }
 0x1e3   : > { %972 = vrot.lane.b32.xlu1 %v685_v22, %s2559_s21  ;;  %970 = vrot.lane.b32.xlu0 %v684_v23, %s2559_s21 }
 0x1e7   : > { %1079 = vrot.lane.b32.xlu1 %v685_v22, %s2557_s19  ;;  %1077 = vrot.lane.b32.xlu0 %v684_v23, %s2557_s19  ;;  %s1844_s19 = sshll.u32 %s1988_s25, 4  ;;  %s1845_s19 = int_to_ptr.vmem [resolvable:$false] %s1844_s19 }
 0x1e8   : > { %s1846_s21 = scalar_lea.vmem %s1845_s19, 512  ;;  %p1847_p2 = scmp.lt.s32.totalorder %s2422_s15, %s1845_s19 }
 0x1e9   : > { %p1848_p4 = scmp.lt.s32.totalorder %s1846_s21, %s1840_s17 }
 0x1eb   : > { %p1849_p9 = por %p1848_p4, %p1847_p2 }
 0x1ed   : > { %p1850_p8 = pnand %p1849_p9, %p1843_p11 }
 0x245   : > { %v890_v25 = vpop.permute.xlu1 %889  ;;  %v781_v26 = vpop.permute.xlu0 %780 }
 0x249   : > { %v888_v31 = vpop.permute.xlu1 %887  ;;  %v779_v32 = vpop.permute.xlu0 %778 }
 0x24a   : > { %1438 = vmatprep.mubr.msk.f32.mxu1 %vm687_vm1, %v779_v32  ;;  %1443 = vmatprep.mubr.msk.f32.mxu0 %vm687_vm1, %v888_v31 }
 0x24b   : > { %1439 = vmatmul.mubr.msk.f32.vlgmr.msra.gmra.mrb[2].mxu1 %vm687_vm1, %v781_v26  ;;  %1444 = vmatmul.mubr.msk.f32.vlgmr.msra.gmra.mrb[4].mxu0 %vm687_vm1, %v890_v25 }
 0x24c   : > { %1447 = vmatpush3.msra.mxu1 %v2369_v8 }
 0x24d   : > { %v997_v33 = vpop.permute.xlu1 %996  ;;  %v995_v34 = vpop.permute.xlu0 %994 }
 0x24e   : > { %1448 = vmatprep.mubr.msk.f32.mxu1 %vm687_vm1, %v995_v34 }
 0x24f   : > { %1449 = vmatmul.mubr.msk.f32.vlgmr.msra.gmra.mrb[4].mxu1 %vm687_vm1, %v997_v33 }
 0x2a8   : > { %v1435_v37 = vpop.f32.mrb[2].mxu0 }
 0x2a9   : > { %v772_v39 = vmul.f32 %v1435_v37, %v683_v35  ;;  %v760_v40 = vpop.f32.mrb[3].mxu0 }
 0x2aa   : > { %v771_v42 = vmul.f32 %v760_v40, %v682_v36 }
 0x2ab   : > { %v774_v43 = vadd.f32 %v772_v39, %v770_v38 }
 0x2ac   : > { %v773_v44 = vadd.f32 %v771_v42, %v769_v41 }
 0x2ad   : > { %776 = vst.msk [vmem:[%s2414_s26 + $0x8] sm:$0xff] %vm687_vm1, %v774_v43 }
 0x2ae   : > { %775 = vst.msk [vmem:[%s2414_s26] sm:$0xff] %vm687_vm1, %v773_v44 }
 0x31e   : > { %v1440_v45 = vpop.f32.mrb[2].mxu1  ;;  %v1445_v46 = vpop.f32.mrb[4].mxu0 }
 0x31f   : > { %v872_v47 = vmul.f32 %v1440_v45, %v683_v35  ;;  %v852_v48 = vpop.f32.mrb[3].mxu1  ;;  %v961_v49 = vpop.f32.mrb[5].mxu0  ;;  %v979_v52 = vmul.f32 %v1445_v46, %v683_v35 }
 0x320   : > { %v871_v50 = vmul.f32 %v852_v48, %v682_v36 }
 0x321   : > { %877 = vrot.lane.b32.xlu1 %v872_v47, %s1985_s9 }
 0x322   : > { %875 = vrot.lane.b32.xlu0 %v871_v50, %s1985_s9  ;;  %v1450_v51 = vpop.f32.mrb[4].mxu1 }
 0x323   : > { %v1068_v53 = vpop.f32.mrb[5].mxu1 }
 0x324   : > { %1853 = shalt.err (!%p1850_p8)
}
 0x325   : > { %s1854_s20 = scalar_lea.hbm %s2430_s1, 256  ;;  %s1858_s25 = scalar_lea.hbm %s2584_s8, 512 }
 0x326   : > { %p1855_p3 = scmp.ne.s32.totalorder %s2430_s1, %s1854_s20  ;;  %p1859_p0 = scmp.lt.u32.totalorder %s2430_s1, %s2584_s8 }
 0x327   : > { %p1860_p1 = scmp.lt.u32.totalorder %s1858_s25, %s1854_s20  ;;  %p1862_p6 = scmp.lt.u32.totalorder %s1854_s20, %s2430_s1 }
 0x328   : > { %p1856_p12 = pnand %p1855_p3, %p2585_p5 }
 0x329   : > { %p1861_p7 = por %p1860_p1, %p1859_p0 }
 0x32a   : > { %p1857_p13 = pneg %p1856_p12 }
 0x32b   : > { %p1863_p10 = por %p1862_p6, %p1861_p7 }
 0x32d   : > { %p1864_p11 = pnand %p1863_p10, %p1857_p13 }
 0x32f   : > { %1867 = shalt.err (!%p1864_p11)
}
 0x330   : > { %s2562_s21 = smov 128   ;;  %s2586_s17 = scalar_lea.sflag [#allocation18], %s2339_s23  ;;  %v978_v54 = vmul.f32 %v961_v49, %v682_v36  ;;  %v1086_v55 = vmul.f32 %v1450_v51, %v683_v35  ;;  %v1085_v56 = vmul.f32 %v1068_v53, %v682_v36  ;;  %v866_v57 = vpop.permute.xlu1 %865  ;;  %v864_v58 = vpop.permute.xlu0 %863  ;;  %vm883_vm3 = vcmask 130112  }
 0x331   : > { %1498 = dma.vmem_to_hbm [thread:$0]  (%p2585_p5), %s2422_s15, 256, %s2430_s1, %s2586_s17, %s2562_s21, %s2562_s21, %s1985_s9   ;;  %v870_v63 = vmul.f32 %v866_v57, %v2378_v20  ;;  %v869_v0 = vmul.f32 %v864_v58, %v2380_v21  ;;  %vm990_vm4 = vcmask 195712   ;;  %vm1097_vm5 = vcmask 261312  }
 0x332   : > { %s2587_s27 = smov 16   ;;  %s2588_s16 = smov 24  }
 0x333   : > { %984 = vrot.lane.b32.xlu1 %v979_v52, %s2587_s27  ;;  %982 = vrot.lane.b32.xlu0 %v978_v54, %s2587_s27  ;;  %s1124_s15 = sshll.u32 %s2414_s26, 4  ;;  %s2589_s1 = sshll.u32 %s2583_s28, 8  ;;  %s2482_s15 = int_to_ptr.vmem [resolvable:$true] %s1124_s15 }
 0x334   : > { %v973_v59 = vpop.permute.xlu1 %972  ;;  %v971_v60 = vpop.permute.xlu0 %970  ;;  %s2590_s25 = sld [smem:[#allocation28_spill]]  ;;  %s1104_s17 = scalar_lea.sflag [#allocation4], %s2339_s23 }
 0x335   : > { %v977_v5 = vmul.f32 %v973_v59, %v2378_v20  ;;  %v976_v6 = vmul.f32 %v971_v60, %v2380_v21  ;;  %s1868_s27 = scalar_lea.vmem %s2482_s15, 256 }
 0x336   : > { %p1869_p2 = scmp.ne.s32.totalorder %s2482_s15, %s1868_s27 }
 0x337   : > { %1091 = vrot.lane.b32.xlu1 %v1086_v55, %s2588_s16  ;;  %1089 = vrot.lane.b32.xlu0 %v1085_v56, %s2588_s16  ;;  %s1990_s16 = smov [#allocation16]  }
 0x338   : > { %v1080_v61 = vpop.permute.xlu1 %1079  ;;  %v1078_v62 = vpop.permute.xlu0 %1077  ;;  %p1870_p4 = pnand %p1869_p2, %p2585_p5  ;;  %s1872_s28 = sshll.u32 %s1990_s16, 4  ;;  %s1873_s28 = int_to_ptr.vmem [resolvable:$false] %s1872_s28 }
 0x339   : > { %v1084_v11 = vmul.f32 %v1080_v61, %v2378_v20  ;;  %v1083_v12 = vmul.f32 %v1078_v62, %v2380_v21  ;;  %s1874_s21 = scalar_lea.vmem %s1873_s28, 512  ;;  %p1875_p8 = scmp.lt.s32.totalorder %s2482_s15, %s1873_s28 }
 0x33a   : > { %s2480_s19 = scalar_lea.hbm %s2590_s25, %s2589_s1  ;;  %p1871_p9 = pneg %p1870_p4 }
 0x33b   : > { %p1876_p3 = scmp.lt.s32.totalorder %s1874_s21, %s1868_s27 }
 0x33d   : > { %p1877_p12 = por %p1876_p3, %p1875_p8 }
 0x33f   : > { %p1878_p13 = pnand %p1877_p12, %p1871_p9 }
 0x393   : > { %v878_v1 = vpop.permute.xlu1 %877 }
 0x394   : > { %v882_v2 = vadd.f32 %v878_v1, %v870_v63  ;;  %v876_v3 = vpop.permute.xlu0 %875 }
 0x395   : > { %v881_v4 = vadd.f32 %v876_v3, %v869_v0 }
 0x396   : > { %885 = vst.msk [vmem:[%s2414_s26 + $0x8] sm:$0xff] %vm883_vm3, %v882_v2 }
 0x397   : > { %884 = vst.msk [vmem:[%s2414_s26] sm:$0xff] %vm883_vm3, %v881_v4 }
 0x3a5   : > { %v985_v7 = vpop.permute.xlu1 %984  ;;  %v983_v9 = vpop.permute.xlu0 %982 }
 0x3a6   : > { %v989_v8 = vadd.f32 %v985_v7, %v977_v5  ;;  %v988_v10 = vadd.f32 %v983_v9, %v976_v6 }
 0x3a8   : > { %992 = vst.msk [vmem:[%s2414_s26 + $0x8] sm:$0xff] %vm990_vm4, %v989_v8  ;;  %991 = vst.msk [vmem:[%s2414_s26] sm:$0xff] %vm990_vm4, %v988_v10 }
 0x3a9   : > { %v1092_v13 = vpop.permute.xlu1 %1091  ;;  %v1090_v15 = vpop.permute.xlu0 %1089 }
 0x3aa   : > { %v1096_v14 = vadd.f32 %v1092_v13, %v1084_v11  ;;  %v1095_v16 = vadd.f32 %v1090_v15, %v1083_v12 }
 0x3ac   : > { %1099 = vst.msk [vmem:[%s2414_s26 + $0x8] sm:$0xff] %vm1097_vm5, %v1096_v14  ;;  %1098 = vst.msk [vmem:[%s2414_s26] sm:$0xff] %vm1097_vm5, %v1095_v16 }
 0x3ad   : > { %1881 = shalt.err (!%p1878_p13)
}
 0x3ae   : > { %s1882_s26 = scalar_lea.hbm %s2480_s19, 256  ;;  %s1886_s29 = scalar_lea.hbm %s2590_s25, 512 }
 0x3af   : > { %p1883_p0 = scmp.ne.s32.totalorder %s2480_s19, %s1882_s26  ;;  %p1887_p6 = scmp.lt.u32.totalorder %s2480_s19, %s2590_s25 }
 0x3b0   : > { %p1888_p10 = scmp.lt.u32.totalorder %s1886_s29, %s1882_s26  ;;  %p1890_p2 = scmp.lt.u32.totalorder %s1882_s26, %s2480_s19 }
 0x3b1   : > { %p1884_p1 = pnand %p1883_p0, %p2585_p5 }
 0x3b2   : > { %p1889_p11 = por %p1888_p10, %p1887_p6 }
 0x3b3   : > { %p1885_p7 = pneg %p1884_p1 }
 0x3b4   : > { %p1891_p4 = por %p1890_p2, %p1889_p11 }
 0x3b6   : > { %p1892_p9 = pnand %p1891_p4, %p1885_p7 }
 0x3b8   : > { %1895 = shalt.err (!%p1892_p9)
}
 0x3b9   : > { %s2591_s21 = smov 128  }
 0x3ba   : > { %1497 = dma.vmem_to_hbm [thread:$0]  (%p2585_p5), %s2482_s15, 256, %s2480_s19, %s1104_s17, %s2591_s21, %s2591_s21, %s1985_s9  }
 0x3bb PF: > { %s1157_s27 = sand.u32 1, %s1950_s30   ;;  %p2592_p8 = scmp.ne.s32.totalorder %s2578_s12, 0 }
 0x3bc   : > { %p2593_p3 = scmp.ge.s32.totalorder %s1970_s14, 2  ;;  %s1158_s26 = scalar_lea.sflag [#allocation4], %s1157_s27 }
 0x3be   : > { %p1528_p12 = pnand %p2593_p3, %p2592_p8 }
 0x3c0   : > { %1941 = dma.done.wait (!%p1528_p12), %s1158_s26, 256  }
 0x3c1   : > { %1943 = vsyncadd (!%p1528_p12), %s1158_s26, 4294967040  ;;  %s1167_s22 = scalar_lea.sflag [#allocation18], %s1157_s27 }
 0x3c2   : > { %1945 = dma.done.wait (!%p1528_p12), %s1167_s22, 256  }
 0x3c3   : > { %1947 = vsyncadd (!%p1528_p12), %s1167_s22, 4294967040  ;;  %s33_s14 = sadd.s32 1, %s1970_s14   ;;  %s2594_s30 = smov %s1954_s10 }
 0x3c4   : > { %p30_p13 = scmp.ge.s32.totalorder %s33_s14, 4   ;;  %s2595_s10 = smov %s1958_s11 }
 0x3c5   : > { %s2596_s11 = smov %s2284_s24  ;;  %s2597_s12 = smov %s1966_s13 }
 0x3c6   : > { %s2598_s13 = smov %s2600_s18  ;;  %32 = sbr.rel (!%p30_p13) target bundleno = 16 (0x10), region = 144 }
 0x3cd   :  { %1172 = vsyncpa [#allocation3], 1 }
 0x3ce   :  { %1174 = vsyncpa [#allocation3 + $0x1], 1 }
 0x3cf   :  { %1175 = vsyncpa [#allocation6], 1 }
 0x3d0   :  { %1176 = vsyncpa [#allocation9], 1 }
 0x3d1   :  { %1177 = vsyncpa [#allocation12], 1 }
 0x3d2   :  { %1178 = vsyncpa [#allocation15], 1 }
 0x3d3   :  { %1179 = vsyncpa [#allocation4], 1 }
 0x3d4   :  { %1181 = vsyncpa [#allocation4 + $0x1], 1 }
 0x3d5   :  { %1182 = vsyncpa [#allocation18], 1 }
 0x3d6   :  { %1184 = vsyncpa [#allocation18 + $0x1], 1 }

// kernel: tpu_custom_call.1
= control target key start
LH: loop header
LB: loop body
LE: loop exit
PB: predicated region body
PF: predicated region fallthrough
CT: control target
= control target key end

     0   :  { %s2536_s0 = inlined_call_operand.hbm [shape: f32[2,16,32], index: 0, kind: input, shape index: {}]   ;;  %s2537_s1 = inlined_call_operand.hbm [shape: f32[32,32], index: 1, kind: input, shape index: {}]   ;;  %s2538_s2 = inlined_call_operand.hbm [shape: f32[1,32], index: 2, kind: input, shape index: {}]   ;;  %s2539_s3 = inlined_call_operand.hbm [shape: f32[32,64], index: 3, kind: input, shape index: {}]   ;;  %s2540_s4 = inlined_call_operand.hbm [shape: f32[1,64], index: 4, kind: input, shape index: {}]   ;;  %s2541_s5 = inlined_call_operand.hbm [shape: f32[8,8], index: 5, kind: input, shape index: {}]   ;;  %s2542_s6 = inlined_call_operand.hbm [shape: f32[16,8], index: 6, kind: input, shape index: {}]   ;;  %s2543_s7 = inlined_call_operand.hbm [shape: f32[16,8], index: 7, kind: input, shape index: {}]   ;;  %s2544_s8 = inlined_call_operand.hbm [shape: f32[2,16,32], index: 8, kind: output, shape index: {0}]   ;;  %s2545_s9 = inlined_call_operand.hbm [shape: f32[2,16,64], index: 9, kind: output, shape index: {1}]  }
   0x1   :  { %2563 = sst [smem:[#allocation27_spill]] %s2537_s1 }
   0x2   :  { %2564 = sst [smem:[#allocation28_spill]] %s2544_s8 }
   0x3   :  { %2565 = sst [smem:[#allocation29_spill]] %s2545_s9 }
   0x4   :  { %15 = vsyncpa [#allocation3], 0 }
   0x5   :  { %17 = vsyncpa [#allocation3 + $0x1], 0 }
   0x6   :  { %18 = vsyncpa [#allocation6], 0 }
   0x7   :  { %19 = vsyncpa [#allocation9], 0 }
   0x8   :  { %20 = vsyncpa [#allocation12], 0 }
   0x9   :  { %21 = vsyncpa [#allocation15], 0 }
   0xa   :  { %22 = vsyncpa [#allocation4], 0 }
   0xb   :  { %24 = vsyncpa [#allocation4 + $0x1], 0 }
   0xc   :  { %25 = vsyncpa [#allocation18], 0 }
   0xd   :  { %27 = vsyncpa [#allocation18 + $0x1], 0  ;;  %s2041_s30 = smov 0   ;;  %s2043_s10 = smov 0  }
   0xe   :  { %s2045_s11 = smov 0   ;;  %s2047_s12 = smov 0  }
   0xf   :  { %s2049_s13 = smov 0   ;;  %s2051_s14 = smov 0  }
  0x10 LB: > { %2566 = sst [smem:[#allocation26_spill]] %s1962_s12  ;;  %s2546_s15 = sadd.s32 4294967295, %s1970_s14   ;;  %s1970_s14 = sphi %s2051_s14, %s33_s14   ;;  %s1966_s13 = sphi %s2049_s13, %s2598_s13   ;;  %s1962_s12 = sphi %s2047_s12, %s2597_s12   ;;  %s1958_s11 = sphi %s2045_s11, %s2596_s11   ;;  %s1954_s10 = sphi %s2043_s10, %s2595_s10   ;;  %s1950_s30 = sphi %s2041_s30, %s2594_s30  }
  0x11   : > { %p1337_p0 = scmp.ge.s32.totalorder %s1970_s14, 1  ;;  %p2075_p1 = scmp.eq.s32.totalorder %s2546_s15, 0 }
  0x12   : > { %p291_p2 = scmp.lt.s32.totalorder %s1970_s14, 3  ;;  %s1972_s18 = smov [#allocation5]  }
  0x13   : > { %s2567_s16 = scalar_select %p2075_p1, 1, 0 }
  0x14   : > { %p2080_p3 = pnand %p1337_p0, %p291_p2  ;;  %s303_s19 = sshll.u32 %s1972_s18, 4  ;;  %s2084_s19 = int_to_ptr.vmem [resolvable:$true] %s303_s19 }
  0x15   : > { %s1973_s21 = smov [#allocation8]   ;;  %s1974_s23 = smov [#allocation11]  }
  0x16   : > { %s2568_s17 = scalar_select %p2080_p3, 1, 0 }
  0x17   : > { %p1501_p4 = pneg %p2080_p3  ;;  %s327_s22 = sshll.u32 %s1973_s21, 4  ;;  %s2095_s22 = int_to_ptr.vmem [resolvable:$true] %s327_s22 }
  0x18   : > { %s2097_s24 = sshll.u32 %s1974_s23, 4  ;;  %s2570_s1 = sld [smem:[#allocation27_spill]]  ;;  %s353_s24 = int_to_ptr.vmem [resolvable:$true] %s2097_s24 }
  0x19   : > { %p2091_p6 = pnand %p1501_p4, %p2075_p1 }
  0x1b   : > { %p2107_p8 = pneg %p2091_p6 }
  0x1e   : > { %s1614_s27 = scalar_lea.hbm %s2570_s1, 512 }
  0x1f   : > { %p1615_p7 = scmp.ne.s32.totalorder %s2570_s1, %s1614_s27  ;;  %p1621_p11 = scmp.lt.u32.totalorder %s1614_s27, %s2570_s1 }
  0x21   : > { %p1617_p9 = pnand %p2107_p8, %p1615_p7 }
  0x23   : > { %p1618_p10 = pneg %p1617_p9 }
  0x25   : > { %p1623_p12 = pnand %p1621_p11, %p1618_p10 }
  0x27   : > { %1626 = shalt.err (!%p1623_p12)
}
  0x28   : > { %s1627_s25 = scalar_lea.vmem %s2084_s19, 512  ;;  %p1635_p4 = scmp.lt.s32.totalorder %s2084_s19, %s2084_s19 }
  0x29   : > { %p1628_p13 = scmp.ne.s32.totalorder %s2084_s19, %s1627_s25  ;;  %p1636_p5 = scmp.lt.s32.totalorder %s1627_s25, %s1627_s25 }
  0x2b   : > { %p1630_p0 = pnand %p1628_p13, %p2107_p8  ;;  %p1637_p7 = por %p1636_p5, %p1635_p4 }
  0x2d   : > { %p1631_p2 = pneg %p1630_p0 }
  0x2f   : > { %p1638_p9 = pnand %p1637_p7, %p1631_p2 }
  0x31   : > { %1641 = shalt.err (!%p1638_p9)
}
  0x32   : > { %s2553_s26 = smov 128   ;;  %s2555_s27 = smov 8  }
  0x33   : > { %1504 = dma.hbm_to_vmem [thread:$0]  (!%p2091_p6), %s2570_s1, 512, %s2084_s19, [#allocation6], %s2553_s26, %s2553_s26, %s2555_s27  }
  0x34   : > { %s1642_s25 = scalar_lea.hbm %s2539_s3, 512 }
  0x35   : > { %p1643_p5 = scmp.ne.s32.totalorder %s2539_s3, %s1642_s25  ;;  %p1649_p12 = scmp.lt.u32.totalorder %s1642_s25, %s2539_s3 }
  0x37   : > { %p1645_p10 = pnand %p1643_p5, %p2107_p8 }
  0x39   : > { %p1646_p11 = pneg %p1645_p10 }
  0x3b   : > { %p1651_p13 = pnand %p1649_p12, %p1646_p11 }
  0x3d   : > { %1654 = shalt.err (!%p1651_p13)
}
  0x3e   : > { %s1655_s19 = scalar_lea.vmem %s2095_s22, 512  ;;  %p1663_p7 = scmp.lt.s32.totalorder %s2095_s22, %s2095_s22 }
  0x3f   : > { %p1656_p0 = scmp.ne.s32.totalorder %s2095_s22, %s1655_s19  ;;  %p1664_p9 = scmp.lt.s32.totalorder %s1655_s19, %s1655_s19 }
  0x41   : > { %p1658_p2 = pnand %p1656_p0, %p2107_p8  ;;  %p1665_p5 = por %p1664_p9, %p1663_p7 }
  0x43   : > { %p1659_p4 = pneg %p1658_p2 }
  0x45   : > { %p1666_p10 = pnand %p1665_p5, %p1659_p4 }
  0x47   : > { %1669 = shalt.err (!%p1666_p10)
}
  0x48   : > { %1510 = dma.hbm_to_vmem [thread:$0]  (!%p2091_p6), %s2539_s3, 512, %s2095_s22, [#allocation9], %s2553_s26, %s2553_s26, %s2555_s27  }
  0x49   : > { %s1670_s28 = scalar_lea.hbm %s2541_s5, 128 }
  0x4a   : > { %p1671_p11 = scmp.ne.s32.totalorder %s2541_s5, %s1670_s28  ;;  %p1677_p0 = scmp.lt.u32.totalorder %s1670_s28, %s2541_s5 }
  0x4c   : > { %p1673_p12 = pnand %p1671_p11, %p2107_p8 }
  0x4e   : > { %p1674_p13 = pneg %p1673_p12 }
  0x50   : > { %p1679_p2 = pnand %p1677_p0, %p1674_p13 }
  0x52   : > { %1682 = shalt.err (!%p1679_p2)
}
  0x53   : > { %s1683_s19 = scalar_lea.vmem %s353_s24, 128  ;;  %p1691_p5 = scmp.lt.s32.totalorder %s353_s24, %s353_s24 }
  0x54   : > { %p1684_p4 = scmp.ne.s32.totalorder %s353_s24, %s1683_s19  ;;  %p1692_p10 = scmp.lt.s32.totalorder %s1683_s19, %s1683_s19 }
  0x56   : > { %p1686_p7 = pnand %p1684_p4, %p2107_p8  ;;  %p1693_p3 = por %p1692_p10, %p1691_p5 }
  0x58   : > { %p1687_p9 = pneg %p1686_p7 }
  0x5a   : > { %p1694_p1 = pnand %p1693_p3, %p1687_p9 }
  0x5c   : > { %1697 = shalt.err (!%p1694_p1)
}
  0x5d   : > { %1516 = dma.hbm_to_vmem [thread:$0]  (!%p2091_p6), %s2541_s5, 128, %s353_s24, [#allocation12]  }
  0x5e   : > { %s1977_s9 = smov [#allocation7]   ;;  %s1978_s15 = smov [#allocation10]  }
  0x5f   : > { %s317_s12 = sshll.u32 %s1977_s9, 4  ;;  %s341_s28 = sshll.u32 %s1978_s15, 4  ;;  %s318_s12 = int_to_ptr.vmem [resolvable:$true] %s317_s12  ;;  %s342_s28 = int_to_ptr.vmem [resolvable:$true] %s341_s28 }
  0x60   : > { %s1698_s23 = scalar_lea.hbm %s2538_s2, 16 }
  0x61   : > { %p1699_p1 = scmp.ne.s32.totalorder %s2538_s2, %s1698_s23  ;;  %p1705_p12 = scmp.lt.u32.totalorder %s1698_s23, %s2538_s2 }
  0x63   : > { %p1701_p3 = pnand %p1699_p1, %p2107_p8 }
  0x65   : > { %p1702_p11 = pneg %p1701_p3 }
  0x67   : > { %p1707_p13 = pnand %p1705_p12, %p1702_p11 }
  0x69   : > { %1710 = shalt.err (!%p1707_p13)
}
  0x6a   : > { %s1711_s24 = scalar_lea.vmem %s318_s12, 16  ;;  %s1718_s8 = scalar_lea.vmem %s318_s12, 32 }
  0x6b   : > { %p1712_p0 = scmp.ne.s32.totalorder %s318_s12, %s1711_s24  ;;  %p1719_p7 = scmp.lt.s32.totalorder %s318_s12, %s318_s12 }
  0x6c   : > { %p1720_p9 = scmp.lt.s32.totalorder %s1718_s8, %s1711_s24 }
  0x6d   : > { %p1714_p2 = pnand %p1712_p0, %p2107_p8 }
  0x6e   : > { %p1721_p5 = por %p1720_p9, %p1719_p7 }
  0x6f   : > { %p1715_p4 = pneg %p1714_p2 }
  0x71   : > { %p1722_p10 = pnand %p1721_p5, %p1715_p4 }
  0x73   : > { %1725 = shalt.err (!%p1722_p10)
}
  0x74   : > { %1507 = dma.hbm_to_vmem [thread:$0]  (!%p2091_p6), %s2538_s2, 16, %s318_s12, [#allocation6]  }
  0x75   : > { %s1726_s21 = scalar_lea.hbm %s2540_s4, 16 }
  0x76   : > { %p1727_p1 = scmp.ne.s32.totalorder %s2540_s4, %s1726_s21  ;;  %p1733_p12 = scmp.lt.u32.totalorder %s1726_s21, %s2540_s4 }
  0x78   : > { %p1729_p3 = pnand %p1727_p1, %p2107_p8 }
  0x7a   : > { %p1730_p11 = pneg %p1729_p3 }
  0x7c   : > { %p1735_p13 = pnand %p1733_p12, %p1730_p11 }
  0x7e   : > { %1738 = shalt.err (!%p1735_p13)
}
  0x7f   : > { %s1739_s24 = scalar_lea.vmem %s342_s28, 16  ;;  %s1746_s12 = scalar_lea.vmem %s342_s28, 32 }
  0x80   : > { %p1740_p0 = scmp.ne.s32.totalorder %s342_s28, %s1739_s24  ;;  %p1747_p7 = scmp.lt.s32.totalorder %s342_s28, %s342_s28 }
  0x81   : > { %p1748_p9 = scmp.lt.s32.totalorder %s1746_s12, %s1739_s24 }
  0x82   : > { %p1742_p2 = pnand %p1740_p0, %p2107_p8 }
  0x83   : > { %p1749_p5 = por %p1748_p9, %p1747_p7 }
  0x84   : > { %p1743_p4 = pneg %p1742_p2 }
  0x86   : > { %p1750_p10 = pnand %p1749_p5, %p1743_p4 }
  0x88   : > { %1753 = shalt.err (!%p1750_p10)
}
  0x89   : > { %1513 = dma.hbm_to_vmem [thread:$0]  (!%p2091_p6), %s2540_s4, 16, %s342_s28, [#allocation9]  }
  0x8a   : > { %s1979_s15 = smov [#allocation13]   ;;  %s1980_s29 = smov [#allocation14]  }
  0x8b   : > { %s365_s26 = sshll.u32 %s1979_s15, 4  ;;  %s381_s21 = sshll.u32 %s1980_s29, 4  ;;  %s366_s26 = int_to_ptr.vmem [resolvable:$true] %s365_s26  ;;  %s382_s21 = int_to_ptr.vmem [resolvable:$true] %s381_s21 }
  0x8c   : > { %s1754_s19 = scalar_lea.hbm %s2542_s6, 256 }
  0x8d   : > { %p1755_p1 = scmp.ne.s32.totalorder %s2542_s6, %s1754_s19  ;;  %p1761_p12 = scmp.lt.u32.totalorder %s1754_s19, %s2542_s6 }
  0x8f   : > { %p1757_p3 = pnand %p1755_p1, %p2107_p8 }
  0x91   : > { %p1758_p11 = pneg %p1757_p3 }
  0x93   : > { %p1763_p13 = pnand %p1761_p12, %p1758_p11 }
  0x95   : > { %1766 = shalt.err (!%p1763_p13)
}
  0x96   : > { %s1767_s28 = scalar_lea.vmem %s366_s26, 256  ;;  %p1775_p7 = scmp.lt.s32.totalorder %s366_s26, %s366_s26 }
  0x97   : > { %p1768_p0 = scmp.ne.s32.totalorder %s366_s26, %s1767_s28  ;;  %p1776_p9 = scmp.lt.s32.totalorder %s1767_s28, %s1767_s28 }
  0x99   : > { %p1770_p2 = pnand %p1768_p0, %p2107_p8  ;;  %p1777_p5 = por %p1776_p9, %p1775_p7 }
  0x9b   : > { %p1771_p4 = pneg %p1770_p2 }
  0x9d   : > { %p1778_p10 = pnand %p1777_p5, %p1771_p4 }
  0x9f   : > { %1781 = shalt.err (!%p1778_p10)
}
  0xa0   : > { %s2572_s9 = smov 128   ;;  %s1782_s19 = scalar_lea.hbm %s2543_s7, 256 }
  0xa1   : > { %1519 = dma.hbm_to_vmem [thread:$0]  (!%p2091_p6), %s2542_s6, 256, %s366_s26, [#allocation12], %s2572_s9, %s2572_s9, %s2555_s27  }
  0xa2   : > { %p1783_p1 = scmp.ne.s32.totalorder %s2543_s7, %s1782_s19  ;;  %p1789_p12 = scmp.lt.u32.totalorder %s1782_s19, %s2543_s7 }
  0xa4   : > { %p1785_p3 = pnand %p1783_p1, %p2107_p8 }
  0xa6   : > { %p1786_p11 = pneg %p1785_p3 }
  0xa8   : > { %p1791_p13 = pnand %p1789_p12, %p1786_p11 }
  0xaa   : > { %1794 = shalt.err (!%p1791_p13)
}
  0xab   : > { %s1795_s28 = scalar_lea.vmem %s382_s21, 256  ;;  %p1803_p7 = scmp.lt.s32.totalorder %s382_s21, %s382_s21 }
  0xac   : > { %p1796_p0 = scmp.ne.s32.totalorder %s382_s21, %s1795_s28  ;;  %p1804_p9 = scmp.lt.s32.totalorder %s1795_s28, %s1795_s28 }
  0xae   : > { %p1798_p2 = pnand %p1796_p0, %p2107_p8  ;;  %p1805_p5 = por %p1804_p9, %p1803_p7 }
  0xb0   : > { %p1799_p4 = pneg %p1798_p2 }
  0xb2   : > { %p1806_p10 = pnand %p1805_p5, %p1799_p4 }
  0xb4   : > { %1809 = shalt.err (!%p1806_p10)
}
  0xb5   : > { %1522 = dma.hbm_to_vmem [thread:$0]  (!%p2091_p6), %s2543_s7, 256, %s382_s21, [#allocation15], %s2572_s9, %s2572_s9, %s2555_s27  }
  0xb6   : > { %s1336_s20 = sadd.s32 4294967294, %s1970_s14   ;;  %s45_s18 = sadd.s32 1, %s1966_s13 }
  0xb7   : > { %s54_s29 = sadd.s32 1, %s1958_s11  ;;  %p47_p8 = scmp.ge.s32.totalorder %s45_s18, 2 }
  0xb8   : > { %p61_p1 = scmp.ne.s32.totalorder %s1958_s11, %s1954_s10  ;;  %p62_p3 = scmp.eq.s32.totalorder %s1970_s14, 0 }
  0xb9   : > { %p67_p11 = scmp.ne.s32.totalorder %s1954_s10, %s1950_s30  ;;  %s2600_s18 = smov (%p47_p8, %s45_s18), 0 }
  0xba   : > { %p2264_p12 = por %p62_p3, %p61_p1  ;;  %p2574_p13 = scmp.ne.s32.totalorder %s2567_s16, 0 }
  0xbb   : > { %s49_s25 = ssub.s32 %s1966_s13, %s2600_s18  ;;  %s2576_s19 = sadd.s32 4294967295, %s1970_s14  }
  0xbc   : > { %p2270_p6 = por %p2574_p13, %p67_p11  ;;  %p250_p0 = scmp.eq.s32.totalorder %s2576_s19, 1 }
  0xbd   : > { %p52_p2 = scmp.eq.s32.totalorder %s49_s25, 0  ;;  %p256_p4 = scmp.eq.s32.totalorder %s1336_s20, 1 }
  0xbe   : > { %p2278_p7 = por %p250_p0, %p61_p1  ;;  %p1541_p9 = scmp.lt.s32.totalorder %s1970_s14, 2 }
  0xbf   : > { %s2284_s24 = scalar_select %p52_p2, %s1958_s11, %s54_s29  }
  0xc0   : > { %s2577_s22 = scalar_select %p2278_p7, 1, 0 }
  0xc1   : > { %p2286_p5 = por %p256_p4, %p67_p11  ;;  %s395_s8 = sand.u32 1, %s1958_s11  }
  0xc2   : > { %s1346_s28 = sshll.u32 %s395_s8, 4  ;;  %s1382_s26 = sshll.u32 %s1966_s13, 8 }
  0xc3   : > { %s2578_s12 = scalar_select %p2286_p5, 1, 0 }
  0xc4   : > { %s2295_s19 = scalar_lea.hbm %s2536_s0, %s1382_s26  ;;  %s399_s20 = scalar_lea.vmem [#allocation2], %s1346_s28 }
  0xc5   : > { %s408_s25 = sshll.u32 %s399_s20, 4  ;;  %p2301_p10 = pnand %p1541_p9, %p2264_p12  ;;  %s2297_s25 = int_to_ptr.vmem [resolvable:$true] %s408_s25 }
  0xc6   : > { %s2305_s1 = scalar_lea.sflag [#allocation3], %s395_s8  ;;  %s1810_s27 = scalar_lea.hbm %s2295_s19, 256 }
  0xc7   : > { %p1811_p8 = scmp.ne.s32.totalorder %s2295_s19, %s1810_s27  ;;  %p1812_p1 = pneg %p2301_p10 }
  0xc8   : > { %s1815_s23 = scalar_lea.hbm %s2536_s0, 512  ;;  %p1816_p12 = scmp.lt.u32.totalorder %s2295_s19, %s2536_s0 }
  0xc9   : > { %p1813_p3 = pnand %p1812_p1, %p1811_p8  ;;  %p1817_p13 = scmp.lt.u32.totalorder %s1815_s23, %s1810_s27 }
  0xca   : > { %p1819_p2 = scmp.lt.u32.totalorder %s1810_s27, %s2295_s19 }
  0xcb   : > { %p1814_p11 = pneg %p1813_p3  ;;  %p1818_p0 = por %p1817_p13, %p1816_p12 }
  0xcd   : > { %p1820_p4 = por %p1819_p2, %p1818_p0 }
  0xcf   : > { %p1821_p9 = pnand %p1820_p4, %p1814_p11 }
  0xd1   : > { %1824 = shalt.err (!%p1821_p9)
}
  0xd2   : > { %s1825_s8 = scalar_lea.vmem %s2297_s25, 256  ;;  %s1981_s28 = smov [#allocation2]  }
  0xd3   : > { %p1826_p8 = scmp.ne.s32.totalorder %s2297_s25, %s1825_s8  ;;  %s1830_s26 = sshll.u32 %s1981_s28, 4  ;;  %s1831_s26 = int_to_ptr.vmem [resolvable:$false] %s1830_s26 }
  0xd4   : > { %s1832_s15 = scalar_lea.vmem %s1831_s26, 512  ;;  %p1833_p7 = scmp.lt.s32.totalorder %s2297_s25, %s1831_s26 }
  0xd5   : > { %p1828_p3 = pnand %p1826_p8, %p1812_p1  ;;  %p1834_p12 = scmp.lt.s32.totalorder %s1832_s15, %s1825_s8 }
  0xd7   : > { %p1829_p5 = pneg %p1828_p3  ;;  %p1835_p13 = por %p1834_p12, %p1833_p7 }
  0xd9   : > { %p1836_p0 = pnand %p1835_p13, %p1829_p5 }
  0xdb   : > { %1839 = shalt.err (!%p1836_p0)
}
  0xdc   : > { %s2580_s27 = smov 8   ;;  %p2581_p1 = scmp.ne.s32.totalorder %s2568_s17, 0 }
  0xdd   : > { %1526 = dma.hbm_to_vmem [thread:$0]  (!%p2301_p10), %s2295_s19, 256, %s2297_s25, %s2305_s1, %s2572_s9, %s2572_s9, %s2580_s27  }
  0xde   : > { %420 = sbr.rel (%p2581_p1) target bundleno = 955 (0x3bb), region = 52  ;;  %s2339_s23 = sand.u32 (!%p2581_p1), 1, %s1954_s10  }
  0xdf   : > { %s2342_s20 = sshll.u32 (!%p2581_p1), %s2339_s23, 4  ;;  %s423_s29 = scalar_lea.sflag (!%p2581_p1), [#allocation3], %s2339_s23 }
  0xe0   : > { %s426_s8 = scalar_lea.vmem (!%p2581_p1), [#allocation2], %s2342_s20 }
  0xe5   : > { %1921 = dma.done.wait (%p2270_p6), %s423_s29, 256  }
  0xe6   : > { %1923 = vsyncadd (%p2270_p6), %s423_s29, 4294967040  ;;  %p2582_p7 = scmp.ne.s32.totalorder %s2567_s16, 0 }
  0xe8   : > { %1925 = dma.done.wait (%p2582_p7), [#allocation6], 528  }
  0xe9   : > { %1927 = vsyncadd (%p2582_p7), [#allocation6], 4294966768 }
  0xea   : > { %1929 = dma.done.wait (%p2582_p7), [#allocation9], 528  }
  0xeb   : > { %1931 = vsyncadd (%p2582_p7), [#allocation9], 4294966768 }
  0xec   : > { %1933 = dma.done.wait (%p2582_p7), [#allocation12], 384  }
  0xed   : > { %1935 = vsyncadd (%p2582_p7), [#allocation12], 4294966912 }
  0xee   : > { %1937 = dma.done.wait (%p2582_p7), [#allocation15], 256  }
  0xef   : > { %1939 = vsyncadd (%p2582_p7), [#allocation15], 4294967040  ;;  %vm512_vm0 = vcmask 261120   ;;  %v501_v0 = vld [vmem:[#allocation5] sm:$0xff]  ;;  %v502_v1 = vld [vmem:[#allocation5 + $0x8] sm:$0xff]  ;;  %vm687_vm1 = vcmask 64512  }
  0xf0   : > { %v503_v2 = vld [vmem:[#allocation5 + $0x10] sm:$0xff]  ;;  %v1451_v3 = vpack.c.bf16 %v502_v1, %v501_v0  ;;  %v504_v4 = vld [vmem:[#allocation5 + $0x18] sm:$0xff]  ;;  %v2369_v8 = vld [vmem:[#allocation11] sm:$0xff]  ;;  %s1982_s1 = smov 112   ;;  %s1983_s16 = smov 120   ;;  %vm1100_vm2 = vcmask 523264  }
  0xf1   : > { %v499_v5 = vld [vmem:[%s426_s8] sm:$0xff]  ;;  %v1455_v6 = vpack.c.bf16 %v504_v4, %v503_v2  ;;  %v500_v7 = vld [vmem:[%s426_s8 + $0x8] sm:$0xff]  ;;  %s1984_s17 = smov 104   ;;  %s1985_s9 = smov 8  }
  0xf2   : > { %1417 = vmatprep.mubr.msk.f32.mxu0 %vm512_vm0, %v499_v5  ;;  %1428 = vmatprep.mubr.msk.f32.mxu1 %vm512_vm0, %v499_v5  ;;  %v596_v9 = vld [vmem:[#allocation8] sm:$0xff]  ;;  %v597_v10 = vld [vmem:[#allocation8 + $0x8] sm:$0xff]  ;;  %v598_v11 = vld [vmem:[#allocation8 + $0x10] sm:$0xff]  ;;  %s2559_s21 = smov 16   ;;  %s2557_s19 = smov 24  }
  0xf3   : > { %1452 = vmatprep.subr.bf16.mxu0 %v1451_v3  ;;  %v1459_v12 = vpack.c.bf16 %v597_v10, %v596_v9  ;;  %v599_v13 = vld [vmem:[#allocation8 + $0x18] sm:$0xff]  ;;  %v685_v22 = vld [vmem:[#allocation14 + $0x8] sm:$0xff]  ;;  %v1363_v24 = vld [vmem:[#allocation10] ss:$0 sm:$0xff]  ;;  %s2400_s25 = scalar_lea.vmem [#allocation17], %s2342_s20  ;;  %s2583_s28 = sld [smem:[#allocation26_spill]] }
  0xf4   : > { %1454 = vmatpush3.bf16.msra.mxu0 %v1451_v3  ;;  %v1463_v14 = vpack.c.bf16 %v599_v13, %v598_v11  ;;  %v1360_v15 = vld [vmem:[#allocation7] ss:$0 sm:$0xff]  ;;  %v683_v35 = vld [vmem:[#allocation13 + $0x8] sm:$0xff]  ;;  %v682_v36 = vld [vmem:[#allocation13] sm:$0xff]  ;;  %s2414_s26 = scalar_lea.vmem [#allocation16], %s2342_s20  ;;  %s1142_s15 = sshll.u32 %s2400_s25, 4  ;;  %s2422_s15 = int_to_ptr.vmem [resolvable:$true] %s1142_s15 }
  0xf5   : > { %1456 = vmatprep.subr.bf16.mxu0 %v1455_v6  ;;  %1460 = vmatprep.subr.bf16.mxu1 %v1459_v12  ;;  %v684_v23 = vld [vmem:[#allocation14] sm:$0xff]  ;;  %s2584_s8 = sld [smem:[#allocation29_spill]]  ;;  %p2585_p5 = scmp.ne.s32.totalorder %s2577_s22, 0 }
  0xf6   : > { %1462 = vmatpush3.bf16.msra.mxu1 %v1459_v12 }
  0xf7   : > { %1464 = vmatprep.subr.bf16.mxu1 %v1463_v14 }
  0xf8   : > { %1458 = vmatpush3.bf16.msra.mxu0 %v1455_v6 }
  0xf9   : > { %1431 = vmatprep.subr.mxu0 %v2369_v8  ;;  %s2561_s27 = sshll.u32 %s2583_s28, 8 }
  0xfa   : > { %1466 = vmatpush3.bf16.msra.mxu1 %v1463_v14 }
  0xfb   : > { %1418 = vmatmul.mubr.msk.f32.vlgmr.msra.gmra.mrb[0].mxu0 %vm512_vm0, %v500_v7  ;;  %1436 = vmatprep.subr.mxu1 %v2369_v8 }
  0xfc   : > { %1432 = vmatpush3.msra.mxu0 %v2369_v8 }
  0xfd   : > { %1441 = vmatprep.subr.mxu0 %v2369_v8  ;;  %1429 = vmatmul.mubr.msk.f32.vlgmr.msra.gmra.mrb[0].mxu1 %vm512_vm0, %v500_v7 }
  0xfe   : > { %1437 = vmatpush3.msra.mxu1 %v2369_v8 }
  0xff   : > { %1446 = vmatprep.subr.mxu1 %v2369_v8 }
 0x1ce   : > { %v1419_v16 = vpop.f32.mrb[0].mxu0 }
 0x1cf   : > { %v591_v17 = vadd.f32 %v1419_v16, %v1360_v15  ;;  %v585_v18 = vpop.f32.mrb[1].mxu0 }
 0x1d0   : > { %v586_v19 = vadd.f32 %v1360_v15, %v585_v18  ;;  %v1430_v27 = vpop.f32.mrb[0].mxu1 }
 0x1d1   : > { %v2378_v20 = vmul.f32 0.35355338, %v591_v17  ;;  %v679_v28 = vadd.f32 %v1430_v27, %v1363_v24  ;;  %v673_v29 = vpop.f32.mrb[1].mxu1 }
 0x1d2   : > { %v2380_v21 = vmul.f32 0.35355338, %v586_v19  ;;  %v674_v30 = vadd.f32 %v1363_v24, %v673_v29 }
 0x1d3   : > { %889 = vrot.lane.b32.xlu1 %v2378_v20, %s1982_s1  ;;  %780 = vrot.lane.b32.xlu0 %v2378_v20, %s1983_s16  ;;  %1102 = vst.msk [vmem:[%s2400_s25 + $0x8] sm:$0xff] %vm1100_vm2, %v679_v28  ;;  %v770_v38 = vmul.f32 %v685_v22, %v2378_v20 }
 0x1d4   : > { %1433 = vmatprep.mubr.msk.f32.mxu0 %vm687_vm1, %v2380_v21  ;;  %1101 = vst.msk [vmem:[%s2400_s25] sm:$0xff] %vm1100_vm2, %v674_v30  ;;  %v769_v41 = vmul.f32 %v684_v23, %v2380_v21  ;;  %s1988_s25 = smov [#allocation17]  }
 0x1d5   : > { %1434 = vmatmul.mubr.msk.f32.vlgmr.msra.gmra.mrb[2].mxu0 %vm687_vm1, %v2378_v20 }
 0x1d6   : > { %1442 = vmatpush3.msra.mxu0 %v2369_v8 }
 0x1d7   : > { %887 = vrot.lane.b32.xlu1 %v2380_v21, %s1982_s1  ;;  %778 = vrot.lane.b32.xlu0 %v2380_v21, %s1983_s16  ;;  %s2430_s1 = scalar_lea.hbm %s2584_s8, %s2561_s27 }
 0x1db   : > { %996 = vrot.lane.b32.xlu1 %v2378_v20, %s1984_s17  ;;  %994 = vrot.lane.b32.xlu0 %v2380_v21, %s1984_s17  ;;  %s1840_s17 = scalar_lea.vmem %s2422_s15, 256 }
 0x1dc   : > { %p1841_p6 = scmp.ne.s32.totalorder %s2422_s15, %s1840_s17 }
 0x1de   : > { %p1842_p10 = pnand %p1841_p6, %p2585_p5 }
 0x1df   : > { %865 = vrot.lane.b32.xlu1 %v685_v22, %s1985_s9  ;;  %863 = vrot.lane.b32.xlu0 %v684_v23, %s1985_s9 }
 0x1e0   : > { %p1843_p11 = pneg %p1842_p10 }
 0x1e3   : > { %972 = vrot.lane.b32.xlu1 %v685_v22, %s2559_s21  ;;  %970 = vrot.lane.b32.xlu0 %v684_v23, %s2559_s21 }
 0x1e7   : > { %1079 = vrot.lane.b32.xlu1 %v685_v22, %s2557_s19  ;;  %1077 = vrot.lane.b32.xlu0 %v684_v23, %s2557_s19  ;;  %s1844_s19 = sshll.u32 %s1988_s25, 4  ;;  %s1845_s19 = int_to_ptr.vmem [resolvable:$false] %s1844_s19 }
 0x1e8   : > { %s1846_s21 = scalar_lea.vmem %s1845_s19, 512  ;;  %p1847_p2 = scmp.lt.s32.totalorder %s2422_s15, %s1845_s19 }
 0x1e9   : > { %p1848_p4 = scmp.lt.s32.totalorder %s1846_s21, %s1840_s17 }
 0x1eb   : > { %p1849_p9 = por %p1848_p4, %p1847_p2 }
 0x1ed   : > { %p1850_p8 = pnand %p1849_p9, %p1843_p11 }
 0x245   : > { %v890_v25 = vpop.permute.xlu1 %889  ;;  %v781_v26 = vpop.permute.xlu0 %780 }
 0x249   : > { %v888_v31 = vpop.permute.xlu1 %887  ;;  %v779_v32 = vpop.permute.xlu0 %778 }
 0x24a   : > { %1438 = vmatprep.mubr.msk.f32.mxu1 %vm687_vm1, %v779_v32  ;;  %1443 = vmatprep.mubr.msk.f32.mxu0 %vm687_vm1, %v888_v31 }
 0x24b   : > { %1439 = vmatmul.mubr.msk.f32.vlgmr.msra.gmra.mrb[2].mxu1 %vm687_vm1, %v781_v26  ;;  %1444 = vmatmul.mubr.msk.f32.vlgmr.msra.gmra.mrb[4].mxu0 %vm687_vm1, %v890_v25 }
 0x24c   : > { %1447 = vmatpush3.msra.mxu1 %v2369_v8 }
 0x24d   : > { %v997_v33 = vpop.permute.xlu1 %996  ;;  %v995_v34 = vpop.permute.xlu0 %994 }
 0x24e   : > { %1448 = vmatprep.mubr.msk.f32.mxu1 %vm687_vm1, %v995_v34 }
 0x24f   : > { %1449 = vmatmul.mubr.msk.f32.vlgmr.msra.gmra.mrb[4].mxu1 %vm687_vm1, %v997_v33 }
 0x2a8   : > { %v1435_v37 = vpop.f32.mrb[2].mxu0 }
 0x2a9   : > { %v772_v39 = vmul.f32 %v1435_v37, %v683_v35  ;;  %v760_v40 = vpop.f32.mrb[3].mxu0 }
 0x2aa   : > { %v771_v42 = vmul.f32 %v760_v40, %v682_v36 }
 0x2ab   : > { %v774_v43 = vadd.f32 %v772_v39, %v770_v38 }
 0x2ac   : > { %v773_v44 = vadd.f32 %v771_v42, %v769_v41 }
 0x2ad   : > { %776 = vst.msk [vmem:[%s2414_s26 + $0x8] sm:$0xff] %vm687_vm1, %v774_v43 }
 0x2ae   : > { %775 = vst.msk [vmem:[%s2414_s26] sm:$0xff] %vm687_vm1, %v773_v44 }
 0x31e   : > { %v1440_v45 = vpop.f32.mrb[2].mxu1  ;;  %v1445_v46 = vpop.f32.mrb[4].mxu0 }
 0x31f   : > { %v872_v47 = vmul.f32 %v1440_v45, %v683_v35  ;;  %v852_v48 = vpop.f32.mrb[3].mxu1  ;;  %v961_v49 = vpop.f32.mrb[5].mxu0  ;;  %v979_v52 = vmul.f32 %v1445_v46, %v683_v35 }
 0x320   : > { %v871_v50 = vmul.f32 %v852_v48, %v682_v36 }
 0x321   : > { %877 = vrot.lane.b32.xlu1 %v872_v47, %s1985_s9 }
 0x322   : > { %875 = vrot.lane.b32.xlu0 %v871_v50, %s1985_s9  ;;  %v1450_v51 = vpop.f32.mrb[4].mxu1 }
 0x323   : > { %v1068_v53 = vpop.f32.mrb[5].mxu1 }
 0x324   : > { %1853 = shalt.err (!%p1850_p8)
}
 0x325   : > { %s1854_s20 = scalar_lea.hbm %s2430_s1, 256  ;;  %s1858_s25 = scalar_lea.hbm %s2584_s8, 512 }
 0x326   : > { %p1855_p3 = scmp.ne.s32.totalorder %s2430_s1, %s1854_s20  ;;  %p1859_p0 = scmp.lt.u32.totalorder %s2430_s1, %s2584_s8 }
 0x327   : > { %p1860_p1 = scmp.lt.u32.totalorder %s1858_s25, %s1854_s20  ;;  %p1862_p6 = scmp.lt.u32.totalorder %s1854_s20, %s2430_s1 }
 0x328   : > { %p1856_p12 = pnand %p1855_p3, %p2585_p5 }
 0x329   : > { %p1861_p7 = por %p1860_p1, %p1859_p0 }
 0x32a   : > { %p1857_p13 = pneg %p1856_p12 }
 0x32b   : > { %p1863_p10 = por %p1862_p6, %p1861_p7 }
 0x32d   : > { %p1864_p11 = pnand %p1863_p10, %p1857_p13 }
 0x32f   : > { %1867 = shalt.err (!%p1864_p11)
}
 0x330   : > { %s2562_s21 = smov 128   ;;  %s2586_s17 = scalar_lea.sflag [#allocation18], %s2339_s23  ;;  %v978_v54 = vmul.f32 %v961_v49, %v682_v36  ;;  %v1086_v55 = vmul.f32 %v1450_v51, %v683_v35  ;;  %v1085_v56 = vmul.f32 %v1068_v53, %v682_v36  ;;  %v866_v57 = vpop.permute.xlu1 %865  ;;  %v864_v58 = vpop.permute.xlu0 %863  ;;  %vm883_vm3 = vcmask 130112  }
 0x331   : > { %1498 = dma.vmem_to_hbm [thread:$0]  (%p2585_p5), %s2422_s15, 256, %s2430_s1, %s2586_s17, %s2562_s21, %s2562_s21, %s1985_s9   ;;  %v870_v63 = vmul.f32 %v866_v57, %v2378_v20  ;;  %v869_v0 = vmul.f32 %v864_v58, %v2380_v21  ;;  %vm990_vm4 = vcmask 195712   ;;  %vm1097_vm5 = vcmask 261312  }
 0x332   : > { %s2587_s27 = smov 16   ;;  %s2588_s16 = smov 24  }
 0x333   : > { %984 = vrot.lane.b32.xlu1 %v979_v52, %s2587_s27  ;;  %982 = vrot.lane.b32.xlu0 %v978_v54, %s2587_s27  ;;  %s1124_s15 = sshll.u32 %s2414_s26, 4  ;;  %s2589_s1 = sshll.u32 %s2583_s28, 8  ;;  %s2482_s15 = int_to_ptr.vmem [resolvable:$true] %s1124_s15 }
 0x334   : > { %v973_v59 = vpop.permute.xlu1 %972  ;;  %v971_v60 = vpop.permute.xlu0 %970  ;;  %s2590_s25 = sld [smem:[#allocation28_spill]]  ;;  %s1104_s17 = scalar_lea.sflag [#allocation4], %s2339_s23 }
 0x335   : > { %v977_v5 = vmul.f32 %v973_v59, %v2378_v20  ;;  %v976_v6 = vmul.f32 %v971_v60, %v2380_v21  ;;  %s1868_s27 = scalar_lea.vmem %s2482_s15, 256 }
 0x336   : > { %p1869_p2 = scmp.ne.s32.totalorder %s2482_s15, %s1868_s27 }
 0x337   : > { %1091 = vrot.lane.b32.xlu1 %v1086_v55, %s2588_s16  ;;  %1089 = vrot.lane.b32.xlu0 %v1085_v56, %s2588_s16  ;;  %s1990_s16 = smov [#allocation16]  }
 0x338   : > { %v1080_v61 = vpop.permute.xlu1 %1079  ;;  %v1078_v62 = vpop.permute.xlu0 %1077  ;;  %p1870_p4 = pnand %p1869_p2, %p2585_p5  ;;  %s1872_s28 = sshll.u32 %s1990_s16, 4  ;;  %s1873_s28 = int_to_ptr.vmem [resolvable:$false] %s1872_s28 }
 0x339   : > { %v1084_v11 = vmul.f32 %v1080_v61, %v2378_v20  ;;  %v1083_v12 = vmul.f32 %v1078_v62, %v2380_v21  ;;  %s1874_s21 = scalar_lea.vmem %s1873_s28, 512  ;;  %p1875_p8 = scmp.lt.s32.totalorder %s2482_s15, %s1873_s28 }
 0x33a   : > { %s2480_s19 = scalar_lea.hbm %s2590_s25, %s2589_s1  ;;  %p1871_p9 = pneg %p1870_p4 }
 0x33b   : > { %p1876_p3 = scmp.lt.s32.totalorder %s1874_s21, %s1868_s27 }
 0x33d   : > { %p1877_p12 = por %p1876_p3, %p1875_p8 }
 0x33f   : > { %p1878_p13 = pnand %p1877_p12, %p1871_p9 }
 0x393   : > { %v878_v1 = vpop.permute.xlu1 %877 }
 0x394   : > { %v882_v2 = vadd.f32 %v878_v1, %v870_v63  ;;  %v876_v3 = vpop.permute.xlu0 %875 }
 0x395   : > { %v881_v4 = vadd.f32 %v876_v3, %v869_v0 }
 0x396   : > { %885 = vst.msk [vmem:[%s2414_s26 + $0x8] sm:$0xff] %vm883_vm3, %v882_v2 }
 0x397   : > { %884 = vst.msk [vmem:[%s2414_s26] sm:$0xff] %vm883_vm3, %v881_v4 }
 0x3a5   : > { %v985_v7 = vpop.permute.xlu1 %984  ;;  %v983_v9 = vpop.permute.xlu0 %982 }
 0x3a6   : > { %v989_v8 = vadd.f32 %v985_v7, %v977_v5  ;;  %v988_v10 = vadd.f32 %v983_v9, %v976_v6 }
 0x3a8   : > { %992 = vst.msk [vmem:[%s2414_s26 + $0x8] sm:$0xff] %vm990_vm4, %v989_v8  ;;  %991 = vst.msk [vmem:[%s2414_s26] sm:$0xff] %vm990_vm4, %v988_v10 }
 0x3a9   : > { %v1092_v13 = vpop.permute.xlu1 %1091  ;;  %v1090_v15 = vpop.permute.xlu0 %1089 }
 0x3aa   : > { %v1096_v14 = vadd.f32 %v1092_v13, %v1084_v11  ;;  %v1095_v16 = vadd.f32 %v1090_v15, %v1083_v12 }
 0x3ac   : > { %1099 = vst.msk [vmem:[%s2414_s26 + $0x8] sm:$0xff] %vm1097_vm5, %v1096_v14  ;;  %1098 = vst.msk [vmem:[%s2414_s26] sm:$0xff] %vm1097_vm5, %v1095_v16 }
 0x3ad   : > { %1881 = shalt.err (!%p1878_p13)
}
 0x3ae   : > { %s1882_s26 = scalar_lea.hbm %s2480_s19, 256  ;;  %s1886_s29 = scalar_lea.hbm %s2590_s25, 512 }
 0x3af   : > { %p1883_p0 = scmp.ne.s32.totalorder %s2480_s19, %s1882_s26  ;;  %p1887_p6 = scmp.lt.u32.totalorder %s2480_s19, %s2590_s25 }
 0x3b0   : > { %p1888_p10 = scmp.lt.u32.totalorder %s1886_s29, %s1882_s26  ;;  %p1890_p2 = scmp.lt.u32.totalorder %s1882_s26, %s2480_s19 }
 0x3b1   : > { %p1884_p1 = pnand %p1883_p0, %p2585_p5 }
 0x3b2   : > { %p1889_p11 = por %p1888_p10, %p1887_p6 }
 0x3b3   : > { %p1885_p7 = pneg %p1884_p1 }
 0x3b4   : > { %p1891_p4 = por %p1890_p2, %p1889_p11 }
 0x3b6   : > { %p1892_p9 = pnand %p1891_p4, %p1885_p7 }
 0x3b8   : > { %1895 = shalt.err (!%p1892_p9)
}
 0x3b9   : > { %s2591_s21 = smov 128  }
 0x3ba   : > { %1497 = dma.vmem_to_hbm [thread:$0]  (%p2585_p5), %s2482_s15, 256, %s2480_s19, %s1104_s17, %s2591_s21, %s2591_s21, %s1985_s9  }
 0x3bb PF: > { %s1157_s27 = sand.u32 1, %s1950_s30   ;;  %p2592_p8 = scmp.ne.s32.totalorder %s2578_s12, 0 }
 0x3bc   : > { %p2593_p3 = scmp.ge.s32.totalorder %s1970_s14, 2  ;;  %s1158_s26 = scalar_lea.sflag [#allocation4], %s1157_s27 }
 0x3be   : > { %p1528_p12 = pnand %p2593_p3, %p2592_p8 }
 0x3c0   : > { %1941 = dma.done.wait (!%p1528_p12), %s1158_s26, 256  }
 0x3c1   : > { %1943 = vsyncadd (!%p1528_p12), %s1158_s26, 4294967040  ;;  %s1167_s22 = scalar_lea.sflag [#allocation18], %s1157_s27 }
 0x3c2   : > { %1945 = dma.done.wait (!%p1528_p12), %s1167_s22, 256  }
 0x3c3   : > { %1947 = vsyncadd (!%p1528_p12), %s1167_s22, 4294967040  ;;  %s33_s14 = sadd.s32 1, %s1970_s14   ;;  %s2594_s30 = smov %s1954_s10 }
 0x3c4   : > { %p30_p13 = scmp.ge.s32.totalorder %s33_s14, 4   ;;  %s2595_s10 = smov %s1958_s11 }
 0x3c5   : > { %s2596_s11 = smov %s2284_s24  ;;  %s2597_s12 = smov %s1966_s13 }
 0x3c6   : > { %s2598_s13 = smov %s2600_s18  ;;  %32 = sbr.rel (!%p30_p13) target bundleno = 16 (0x10), region = 144 }
 0x3cd   :  { %1172 = vsyncpa [#allocation3], 1 }
 0x3ce   :  { %1174 = vsyncpa [#allocation3 + $0x1], 1 }
 0x3cf   :  { %1175 = vsyncpa [#allocation6], 1 }
 0x3d0   :  { %1176 = vsyncpa [#allocation9], 1 }
 0x3d1   :  { %1177 = vsyncpa [#allocation12], 1 }
 0x3d2   :  { %1178 = vsyncpa [#allocation15], 1 }
 0x3d3   :  { %1179 = vsyncpa [#allocation4], 1 }
 0x3d4   :  { %1181 = vsyncpa [#allocation4 + $0x1], 1 }
 0x3d5   :  { %1182 = vsyncpa [#allocation18], 1 }
 0x3d6   :  { %1184 = vsyncpa [#allocation18 + $0x1], 1 }

</bundles_post_ra>
